<compile_context>
chip_gen: v5e
topology: v5e:2x2
jax: 0.10.0
libtpu: 0.0.40
codegen_flags: <defaults>
</compile_context>

<pallas_src>
import functools

import jax
import jax.numpy as jnp
from jax import lax
from jax.experimental import pallas as pl
from jax.experimental.pallas import tpu as pltpu

K = 5          # conv kernel size
STRIDE = 2     # conv stride
C1, C2 = 16, 32  # conv1 / conv2 output channels


def _round_up(x, m):
    return (x + m - 1) // m * m


def ecg_kernel(xp_ref, wb_ref, out_ref, *, cin, he_len, l2_cnt, l2, bn):
    """One batch tile (bn samples) of the full forward pass.

    xp_ref : (bn, 4, P_ext, cin)  stride-4 phase-split input (zero padded)
    wb_ref : (R, 32)              packed weights/biases, VMEM-resident
    out_ref: (1, 1, bn)           sigmoid outputs, batch along lanes
    """
    p_ext = xp_ref.shape[2]

    # ---- packed-parameter row offsets (all static Python ints) ----
    o_w1 = 0                     # 5 taps x (cin, 16)
    o_b1 = o_w1 + K * cin
    o_w2 = o_b1 + 1              # 5 taps x (16, 32)
    o_b2 = o_w2 + K * C1
    o_w3 = o_b2 + 1
    o_b3 = o_w3 + 1

    def w1_tap(t):               # (cin, C1)
        return wb_ref[o_w1 + t * cin: o_w1 + (t + 1) * cin, 0:C1]

    def w2_tap(t):               # (C1, C2)
        return wb_ref[o_w2 + t * C1: o_w2 + (t + 1) * C1, 0:C2]

    b1 = wb_ref[o_b1:o_b1 + 1, 0:C1]     # (1, 16)
    b2 = wb_ref[o_b2:o_b2 + 1, 0:C2]     # (1, 32)
    w3 = wb_ref[o_w3:o_w3 + 1, 0:C2]     # (1, 32)
    b3 = wb_ref[o_b3:o_b3 + 1, 0:1]      # (1, 1)

    xp = xp_ref[...]                     # (bn, 4, p_ext, cin)

    def phase_prod(k, t):
        """Full product of phase k with conv1 tap t -> (bn, p_ext, C1)."""
        flat = xp[:, k].reshape(bn * p_ext, cin)           # aligned 2D slab
        q = jnp.dot(flat, w1_tap(t), preferred_element_type=jnp.float32)
        return q.reshape(bn, p_ext, C1)

    # Conv1, decomposed by output parity (stride 2 over stride-4 phases):
    #   even output j reads input 4j..4j+4 = P0[j],P1[j],P2[j],P3[j],P0[j+1]
    #   odd  output j reads input 4j+2..4j+6 = P2[j],P3[j],P0[j+1],P1[j+1],P2[j+1]
    he = (phase_prod(0, 0)[:, 0:he_len]
          + phase_prod(1, 1)[:, 0:he_len]
          + phase_prod(2, 2)[:, 0:he_len]
          + phase_prod(3, 3)[:, 0:he_len]
          + phase_prod(0, 4)[:, 1:he_len + 1])
    ho = (phase_prod(2, 0)[:, 0:he_len]
          + phase_prod(3, 1)[:, 0:he_len]
          + phase_prod(0, 2)[:, 1:he_len + 1]
          + phase_prod(1, 3)[:, 1:he_len + 1]
          + phase_prod(2, 4)[:, 1:he_len + 1])
    he = jnp.maximum(he + b1, 0.0)       # (bn, he_len, 16)
    ho = jnp.maximum(ho + b1, 0.0)

    def h1_prod(h, t):
        """Full product of conv1 outputs with conv2 tap t -> (bn, he_len, C2)."""
        flat = h.reshape(bn * he_len, C1)
        r = jnp.dot(flat, w2_tap(t), preferred_element_type=jnp.float32)
        return r.reshape(bn, he_len, C2)

    # Conv2 output p reads conv1 positions 2p..2p+4:
    #   he[p], ho[p], he[p+1], ho[p+1], he[p+2]
    h2 = (h1_prod(he, 0)[:, 0:l2_cnt]
          + h1_prod(ho, 1)[:, 0:l2_cnt]
          + h1_prod(he, 2)[:, 1:l2_cnt + 1]
          + h1_prod(ho, 3)[:, 1:l2_cnt + 1]
          + h1_prod(he, 4)[:, 2:l2_cnt + 2])
    h2 = jnp.maximum(h2 + b2, 0.0)       # (bn, l2_cnt, 32)

    # AdaptiveAvgPool1d(1): masked mean over the valid conv2 positions
    # (garbage / padded positions never enter the sum).
    pos = lax.broadcasted_iota(jnp.int32, h2.shape, 1)
    pooled = jnp.sum(jnp.where(pos < l2, h2, 0.0), axis=1) * (1.0 / l2)  # (bn, 32)

    # Linear(32, 1) + Sigmoid, computed transposed so the store is lane-dense.
    z = lax.dot_general(w3, pooled, (((1,), (1,)), ((), ())),
                        preferred_element_type=jnp.float32) + b3         # (1, bn)
    out_ref[...] = jax.nn.sigmoid(z).reshape(1, 1, bn)


def simple_ecg_regressor(x_ncl, params, *, bn=4):
    """x_ncl: (N, C_in, L) float32 in PyTorch NCL layout. Returns (N, 1)."""
    N, cin, L = x_ncl.shape
    L1 = (L - K) // STRIDE + 1
    L2 = (L1 - K) // STRIDE + 1
    assert L1 >= K and L2 >= 1, "input length too short for two k=5, s=2 convs"

    # Per-sample padded lengths (multiples of 8 so in-kernel reshapes are
    # tile-aligned and all tap slices stay in range).
    l2_cnt = _round_up(L2, 8)                       # conv2 positions computed
    he_len = _round_up(l2_cnt + 2, 8)               # conv1 even/odd positions
    p_ext = max(_round_up(he_len + 1, 8),           # phase entries the slices need
                _round_up(pl.cdiv(L, 4), 8))        # ... and room for all input
    n_pad = _round_up(N, bn)
    grid = (n_pad // bn,)

    # ---- layout plumbing: pure permutation + zero pad (no K-fold expansion) ----
    x = jnp.transpose(x_ncl, (0, 2, 1)).astype(jnp.float32)          # (N, L, cin)
    x = jnp.pad(x, ((0, n_pad - N), (0, 4 * p_ext - L), (0, 0)))
    xp = x.reshape(n_pad, p_ext, 4, cin).transpose(0, 2, 1, 3)       # (n_pad,4,p_ext,cin)

    # ---- pack every weight/bias into ONE (R, 32) f32 buffer (tap-major) ----
    w1 = jnp.transpose(params["w1"], (2, 1, 0)).reshape(K * cin, C1)  # (K*cin, 16)
    w2 = jnp.transpose(params["w2"], (2, 1, 0)).reshape(K * C1, C2)   # (K*16, 32)
    wb = jnp.concatenate([
        jnp.pad(w1.astype(jnp.float32), ((0, 0), (0, C2 - C1))),
        jnp.pad(params["b1"].reshape(1, C1).astype(jnp.float32),
                ((0, 0), (0, C2 - C1))),
        w2.astype(jnp.float32),
        params["b2"].reshape(1, C2).astype(jnp.float32),
        params["w3"].reshape(1, C2).astype(jnp.float32),
        jnp.full((1, C2), params["b3"].reshape(()), jnp.float32),
    ], axis=0)                                                        # (R, 32)

    kernel = functools.partial(ecg_kernel, cin=cin, he_len=he_len,
                               l2_cnt=l2_cnt, l2=L2, bn=bn)

    out = pl.pallas_call(
        kernel,
        out_shape=jax.ShapeDtypeStruct((grid[0], 1, bn), jnp.float32),
        grid=grid,
        in_specs=[
            # batch tile of the phase-split input (pipelined across the grid)
            pl.BlockSpec((bn, 4, p_ext, cin), lambda i: (i, 0, 0, 0)),
            # packed weights: constant index_map -> DMA'd once, VMEM-resident
            pl.BlockSpec(wb.shape, lambda i: (0, 0)),
        ],
        out_specs=pl.BlockSpec((1, 1, bn), lambda i: (i, 0, 0)),
        compiler_params=pltpu.CompilerParams(
            dimension_semantics=("parallel",)),
    )(xp, wb)

    return out.reshape(n_pad, 1)[:N]


def reference_forward(x_ncl, params):
    """Pure-JAX (XLA) reference matching the PyTorch module."""
    dn = ("NCH", "OIH", "NCH")
    h = lax.conv_general_dilated(x_ncl, params["w1"], (STRIDE,), "VALID",
                                 dimension_numbers=dn)
    h = jax.nn.relu(h + params["b1"][None, :, None])
    h = lax.conv_general_dilated(h, params["w2"], (STRIDE,), "VALID",
                                 dimension_numbers=dn)
    h = jax.nn.relu(h + params["b2"][None, :, None])
    h = jnp.mean(h, axis=-1)                          # AdaptiveAvgPool1d(1)+Flatten
    y = h @ params["w3"].T + params["b3"][None, :]    # Linear(32, 1)
    return jax.nn.sigmoid(y)


def init_params(key, in_channels):
    """Deterministic init (PyTorch-like uniform bounds)."""
    ks = jax.random.split(key, 6)

    def u(k, shape, fan_in):
        bound = 1.0 / jnp.sqrt(float(fan_in))
        return jax.random.uniform(k, shape, jnp.float32, -bound, bound)

    return {
        "w1": u(ks[0], (C1, in_channels, K), in_channels * K),
        "b1": u(ks[1], (C1,), in_channels * K),
        "w2": u(ks[2], (C2, C1, K), C1 * K),
        "b2": u(ks[3], (C2,), C1 * K),
        "w3": u(ks[4], (1, C2), C2),
        "b3": u(ks[5], (1,), C2),
    }


if __name__ == "__main__":
    key = jax.random.PRNGKey(0)
    k_x, k_p = jax.random.split(key)

    N, C_in, L = 8, 4, 64
    x = jax.random.normal(k_x, (N, C_in, L), jnp.float32)
    params = init_params(k_p, C_in)

    out = jax.block_until_ready(simple_ecg_regressor(x, params, bn=4))
    ref = jax.block_until_ready(reference_forward(x, params))

    assert out.shape == (N, 1), out.shape
    assert jnp.allclose(out, ref, rtol=1e-5, atol=1e-5), (out, ref)

    print("KERNEL_OK")
</pallas_src>

<mosaic_0001>
module attributes {stable_mosaic.version = 11 : i64} {
  func.func @ecg_kernel(%arg0: i32, %arg1: memref<4x4x32x4xf32, #tpu.memory_space<vmem>>, %arg2: memref<104x32xf32, #tpu.memory_space<vmem>>, %arg3: memref<1x1x4xf32, #tpu.memory_space<vmem>>) attributes {dimension_semantics = [#tpu.dimension_semantics<parallel>], iteration_bounds = array<i64: 2>, scalar_prefetch = 0 : i64, scratch_operands = 0 : i64, tpu.core_type = #tpu.core_type<tc>, window_params = [{transform_indices = @transform_0, window_bounds = array<i64: 4, 4, 32, 4>}, {pipeline_mode = #tpu.pipeline_mode<synchronous>, transform_indices = @transform_1, window_bounds = array<i64: 104, 32>}, {transform_indices = @transform_2, window_bounds = array<i64: 1, 1, 4>}]} {
    %c20 = arith.constant 20 : index
    %c0 = arith.constant 0 : index
    %0 = vector.load %arg2[%c20, %c0] : memref<104x32xf32, #tpu.memory_space<vmem>>, vector<1x16xf32>
    %c101 = arith.constant 101 : index
    %c0_0 = arith.constant 0 : index
    %1 = vector.load %arg2[%c101, %c0_0] : memref<104x32xf32, #tpu.memory_space<vmem>>, vector<1x32xf32>
    %c102 = arith.constant 102 : index
    %c0_1 = arith.constant 0 : index
    %2 = vector.load %arg2[%c102, %c0_1] : memref<104x32xf32, #tpu.memory_space<vmem>>, vector<1x32xf32>
    %c103 = arith.constant 103 : index
    %c0_2 = arith.constant 0 : index
    %3 = vector.load %arg2[%c103, %c0_2] : memref<104x32xf32, #tpu.memory_space<vmem>>, vector<1x1xf32>
    %c0_3 = arith.constant 0 : index
    %c0_4 = arith.constant 0 : index
    %c0_5 = arith.constant 0 : index
    %c0_6 = arith.constant 0 : index
    %4 = vector.load %arg1[%c0_3, %c0_4, %c0_5, %c0_6] : memref<4x4x32x4xf32, #tpu.memory_space<vmem>>, vector<4x4x32x4xf32>
    %5 = vector.extract_strided_slice %4 {offsets = [0, 0, 0, 0], sizes = [4, 1, 32, 4], strides = [1, 1, 1, 1]} : vector<4x4x32x4xf32> to vector<4x1x32x4xf32>
    %6 = vector.shape_cast %5 : vector<4x1x32x4xf32> to vector<4x32x4xf32>
    %7 = vector.shape_cast %6 : vector<4x32x4xf32> to vector<128x4xf32>
    %c0_7 = arith.constant 0 : index
    %c0_8 = arith.constant 0 : index
    %8 = vector.load %arg2[%c0_7, %c0_8] : memref<104x32xf32, #tpu.memory_space<vmem>>, vector<4x16xf32>
    %cst = arith.constant dense<0.000000e+00> : vector<128x16xf32>
    %9 = tpu.matmul %7, %8, %cst {dimension_numbers = #tpu.dot_dimension_numbers<[1], [0], [0], [1], [0, 0, 1, 1], [], []>} : vector<128x4xf32>, vector<4x16xf32>, vector<128x16xf32> -> vector<128x16xf32>
    %10 = vector.shape_cast %9 : vector<128x16xf32> to vector<4x32x16xf32>
    %11 = vector.extract_strided_slice %10 {offsets = [0, 0, 0], sizes = [4, 24, 16], strides = [1, 1, 1]} : vector<4x32x16xf32> to vector<4x24x16xf32>
    %12 = vector.extract_strided_slice %4 {offsets = [0, 1, 0, 0], sizes = [4, 1, 32, 4], strides = [1, 1, 1, 1]} : vector<4x4x32x4xf32> to vector<4x1x32x4xf32>
    %13 = vector.shape_cast %12 : vector<4x1x32x4xf32> to vector<4x32x4xf32>
    %14 = vector.shape_cast %13 : vector<4x32x4xf32> to vector<128x4xf32>
    %c4 = arith.constant 4 : index
    %c0_9 = arith.constant 0 : index
    %15 = vector.load %arg2[%c4, %c0_9] : memref<104x32xf32, #tpu.memory_space<vmem>>, vector<4x16xf32>
    %cst_10 = arith.constant dense<0.000000e+00> : vector<128x16xf32>
    %16 = tpu.matmul %14, %15, %cst_10 {dimension_numbers = #tpu.dot_dimension_numbers<[1], [0], [0], [1], [0, 0, 1, 1], [], []>} : vector<128x4xf32>, vector<4x16xf32>, vector<128x16xf32> -> vector<128x16xf32>
    %17 = vector.shape_cast %16 : vector<128x16xf32> to vector<4x32x16xf32>
    %18 = vector.extract_strided_slice %17 {offsets = [0, 0, 0], sizes = [4, 24, 16], strides = [1, 1, 1]} : vector<4x32x16xf32> to vector<4x24x16xf32>
    %19 = arith.addf %11, %18 : vector<4x24x16xf32>
    %20 = vector.extract_strided_slice %4 {offsets = [0, 2, 0, 0], sizes = [4, 1, 32, 4], strides = [1, 1, 1, 1]} : vector<4x4x32x4xf32> to vector<4x1x32x4xf32>
    %21 = vector.shape_cast %20 : vector<4x1x32x4xf32> to vector<4x32x4xf32>
    %22 = vector.shape_cast %21 : vector<4x32x4xf32> to vector<128x4xf32>
    %c8 = arith.constant 8 : index
    %c0_11 = arith.constant 0 : index
    %23 = vector.load %arg2[%c8, %c0_11] : memref<104x32xf32, #tpu.memory_space<vmem>>, vector<4x16xf32>
    %cst_12 = arith.constant dense<0.000000e+00> : vector<128x16xf32>
    %24 = tpu.matmul %22, %23, %cst_12 {dimension_numbers = #tpu.dot_dimension_numbers<[1], [0], [0], [1], [0, 0, 1, 1], [], []>} : vector<128x4xf32>, vector<4x16xf32>, vector<128x16xf32> -> vector<128x16xf32>
    %25 = vector.shape_cast %24 : vector<128x16xf32> to vector<4x32x16xf32>
    %26 = vector.extract_strided_slice %25 {offsets = [0, 0, 0], sizes = [4, 24, 16], strides = [1, 1, 1]} : vector<4x32x16xf32> to vector<4x24x16xf32>
    %27 = arith.addf %19, %26 : vector<4x24x16xf32>
    %28 = vector.extract_strided_slice %4 {offsets = [0, 3, 0, 0], sizes = [4, 1, 32, 4], strides = [1, 1, 1, 1]} : vector<4x4x32x4xf32> to vector<4x1x32x4xf32>
    %29 = vector.shape_cast %28 : vector<4x1x32x4xf32> to vector<4x32x4xf32>
    %30 = vector.shape_cast %29 : vector<4x32x4xf32> to vector<128x4xf32>
    %c12 = arith.constant 12 : index
    %c0_13 = arith.constant 0 : index
    %31 = vector.load %arg2[%c12, %c0_13] : memref<104x32xf32, #tpu.memory_space<vmem>>, vector<4x16xf32>
    %cst_14 = arith.constant dense<0.000000e+00> : vector<128x16xf32>
    %32 = tpu.matmul %30, %31, %cst_14 {dimension_numbers = #tpu.dot_dimension_numbers<[1], [0], [0], [1], [0, 0, 1, 1], [], []>} : vector<128x4xf32>, vector<4x16xf32>, vector<128x16xf32> -> vector<128x16xf32>
    %33 = vector.shape_cast %32 : vector<128x16xf32> to vector<4x32x16xf32>
    %34 = vector.extract_strided_slice %33 {offsets = [0, 0, 0], sizes = [4, 24, 16], strides = [1, 1, 1]} : vector<4x32x16xf32> to vector<4x24x16xf32>
    %35 = arith.addf %27, %34 : vector<4x24x16xf32>
    %36 = vector.extract_strided_slice %4 {offsets = [0, 0, 0, 0], sizes = [4, 1, 32, 4], strides = [1, 1, 1, 1]} : vector<4x4x32x4xf32> to vector<4x1x32x4xf32>
    %37 = vector.shape_cast %36 : vector<4x1x32x4xf32> to vector<4x32x4xf32>
    %38 = vector.shape_cast %37 : vector<4x32x4xf32> to vector<128x4xf32>
    %c16 = arith.constant 16 : index
    %c0_15 = arith.constant 0 : index
    %39 = vector.load %arg2[%c16, %c0_15] : memref<104x32xf32, #tpu.memory_space<vmem>>, vector<4x16xf32>
    %cst_16 = arith.constant dense<0.000000e+00> : vector<128x16xf32>
    %40 = tpu.matmul %38, %39, %cst_16 {dimension_numbers = #tpu.dot_dimension_numbers<[1], [0], [0], [1], [0, 0, 1, 1], [], []>} : vector<128x4xf32>, vector<4x16xf32>, vector<128x16xf32> -> vector<128x16xf32>
    %41 = vector.shape_cast %40 : vector<128x16xf32> to vector<4x32x16xf32>
    %42 = vector.extract_strided_slice %41 {offsets = [0, 1, 0], sizes = [4, 24, 16], strides = [1, 1, 1]} : vector<4x32x16xf32> to vector<4x24x16xf32>
    %43 = arith.addf %35, %42 : vector<4x24x16xf32>
    %44 = vector.extract_strided_slice %4 {offsets = [0, 2, 0, 0], sizes = [4, 1, 32, 4], strides = [1, 1, 1, 1]} : vector<4x4x32x4xf32> to vector<4x1x32x4xf32>
    %45 = vector.shape_cast %44 : vector<4x1x32x4xf32> to vector<4x32x4xf32>
    %46 = vector.shape_cast %45 : vector<4x32x4xf32> to vector<128x4xf32>
    %c0_17 = arith.constant 0 : index
    %c0_18 = arith.constant 0 : index
    %47 = vector.load %arg2[%c0_17, %c0_18] : memref<104x32xf32, #tpu.memory_space<vmem>>, vector<4x16xf32>
    %cst_19 = arith.constant dense<0.000000e+00> : vector<128x16xf32>
    %48 = tpu.matmul %46, %47, %cst_19 {dimension_numbers = #tpu.dot_dimension_numbers<[1], [0], [0], [1], [0, 0, 1, 1], [], []>} : vector<128x4xf32>, vector<4x16xf32>, vector<128x16xf32> -> vector<128x16xf32>
    %49 = vector.shape_cast %48 : vector<128x16xf32> to vector<4x32x16xf32>
    %50 = vector.extract_strided_slice %49 {offsets = [0, 0, 0], sizes = [4, 24, 16], strides = [1, 1, 1]} : vector<4x32x16xf32> to vector<4x24x16xf32>
    %51 = vector.extract_strided_slice %4 {offsets = [0, 3, 0, 0], sizes = [4, 1, 32, 4], strides = [1, 1, 1, 1]} : vector<4x4x32x4xf32> to vector<4x1x32x4xf32>
    %52 = vector.shape_cast %51 : vector<4x1x32x4xf32> to vector<4x32x4xf32>
    %53 = vector.shape_cast %52 : vector<4x32x4xf32> to vector<128x4xf32>
    %c4_20 = arith.constant 4 : index
    %c0_21 = arith.constant 0 : index
    %54 = vector.load %arg2[%c4_20, %c0_21] : memref<104x32xf32, #tpu.memory_space<vmem>>, vector<4x16xf32>
    %cst_22 = arith.constant dense<0.000000e+00> : vector<128x16xf32>
    %55 = tpu.matmul %53, %54, %cst_22 {dimension_numbers = #tpu.dot_dimension_numbers<[1], [0], [0], [1], [0, 0, 1, 1], [], []>} : vector<128x4xf32>, vector<4x16xf32>, vector<128x16xf32> -> vector<128x16xf32>
    %56 = vector.shape_cast %55 : vector<128x16xf32> to vector<4x32x16xf32>
    %57 = vector.extract_strided_slice %56 {offsets = [0, 0, 0], sizes = [4, 24, 16], strides = [1, 1, 1]} : vector<4x32x16xf32> to vector<4x24x16xf32>
    %58 = arith.addf %50, %57 : vector<4x24x16xf32>
    %59 = vector.extract_strided_slice %4 {offsets = [0, 0, 0, 0], sizes = [4, 1, 32, 4], strides = [1, 1, 1, 1]} : vector<4x4x32x4xf32> to vector<4x1x32x4xf32>
    %60 = vector.shape_cast %59 : vector<4x1x32x4xf32> to vector<4x32x4xf32>
    %61 = vector.shape_cast %60 : vector<4x32x4xf32> to vector<128x4xf32>
    %c8_23 = arith.constant 8 : index
    %c0_24 = arith.constant 0 : index
    %62 = vector.load %arg2[%c8_23, %c0_24] : memref<104x32xf32, #tpu.memory_space<vmem>>, vector<4x16xf32>
    %cst_25 = arith.constant dense<0.000000e+00> : vector<128x16xf32>
    %63 = tpu.matmul %61, %62, %cst_25 {dimension_numbers = #tpu.dot_dimension_numbers<[1], [0], [0], [1], [0, 0, 1, 1], [], []>} : vector<128x4xf32>, vector<4x16xf32>, vector<128x16xf32> -> vector<128x16xf32>
    %64 = vector.shape_cast %63 : vector<128x16xf32> to vector<4x32x16xf32>
    %65 = vector.extract_strided_slice %64 {offsets = [0, 1, 0], sizes = [4, 24, 16], strides = [1, 1, 1]} : vector<4x32x16xf32> to vector<4x24x16xf32>
    %66 = arith.addf %58, %65 : vector<4x24x16xf32>
    %67 = vector.extract_strided_slice %4 {offsets = [0, 1, 0, 0], sizes = [4, 1, 32, 4], strides = [1, 1, 1, 1]} : vector<4x4x32x4xf32> to vector<4x1x32x4xf32>
    %68 = vector.shape_cast %67 : vector<4x1x32x4xf32> to vector<4x32x4xf32>
    %69 = vector.shape_cast %68 : vector<4x32x4xf32> to vector<128x4xf32>
    %c12_26 = arith.constant 12 : index
    %c0_27 = arith.constant 0 : index
    %70 = vector.load %arg2[%c12_26, %c0_27] : memref<104x32xf32, #tpu.memory_space<vmem>>, vector<4x16xf32>
    %cst_28 = arith.constant dense<0.000000e+00> : vector<128x16xf32>
    %71 = tpu.matmul %69, %70, %cst_28 {dimension_numbers = #tpu.dot_dimension_numbers<[1], [0], [0], [1], [0, 0, 1, 1], [], []>} : vector<128x4xf32>, vector<4x16xf32>, vector<128x16xf32> -> vector<128x16xf32>
    %72 = vector.shape_cast %71 : vector<128x16xf32> to vector<4x32x16xf32>
    %73 = vector.extract_strided_slice %72 {offsets = [0, 1, 0], sizes = [4, 24, 16], strides = [1, 1, 1]} : vector<4x32x16xf32> to vector<4x24x16xf32>
    %74 = arith.addf %66, %73 : vector<4x24x16xf32>
    %75 = vector.extract_strided_slice %4 {offsets = [0, 2, 0, 0], sizes = [4, 1, 32, 4], strides = [1, 1, 1, 1]} : vector<4x4x32x4xf32> to vector<4x1x32x4xf32>
    %76 = vector.shape_cast %75 : vector<4x1x32x4xf32> to vector<4x32x4xf32>
    %77 = vector.shape_cast %76 : vector<4x32x4xf32> to vector<128x4xf32>
    %c16_29 = arith.constant 16 : index
    %c0_30 = arith.constant 0 : index
    %78 = vector.load %arg2[%c16_29, %c0_30] : memref<104x32xf32, #tpu.memory_space<vmem>>, vector<4x16xf32>
    %cst_31 = arith.constant dense<0.000000e+00> : vector<128x16xf32>
    %79 = tpu.matmul %77, %78, %cst_31 {dimension_numbers = #tpu.dot_dimension_numbers<[1], [0], [0], [1], [0, 0, 1, 1], [], []>} : vector<128x4xf32>, vector<4x16xf32>, vector<128x16xf32> -> vector<128x16xf32>
    %80 = vector.shape_cast %79 : vector<128x16xf32> to vector<4x32x16xf32>
    %81 = vector.extract_strided_slice %80 {offsets = [0, 1, 0], sizes = [4, 24, 16], strides = [1, 1, 1]} : vector<4x32x16xf32> to vector<4x24x16xf32>
    %82 = arith.addf %74, %81 : vector<4x24x16xf32>
    %83 = vector.shape_cast %0 : vector<1x16xf32> to vector<1x1x16xf32>
    %84 = vector.broadcast %83 : vector<1x1x16xf32> to vector<4x24x16xf32>
    %85 = arith.addf %43, %84 : vector<4x24x16xf32>
    %cst_32 = arith.constant 0.000000e+00 : f32
    %86 = vector.broadcast %cst_32 : f32 to vector<4x24x16xf32>
    %87 = arith.maximumf %85, %86 : vector<4x24x16xf32>
    %88 = vector.shape_cast %0 : vector<1x16xf32> to vector<1x1x16xf32>
    %89 = vector.broadcast %88 : vector<1x1x16xf32> to vector<4x24x16xf32>
    %90 = arith.addf %82, %89 : vector<4x24x16xf32>
    %cst_33 = arith.constant 0.000000e+00 : f32
    %91 = vector.broadcast %cst_33 : f32 to vector<4x24x16xf32>
    %92 = arith.maximumf %90, %91 : vector<4x24x16xf32>
    %93 = vector.shape_cast %87 : vector<4x24x16xf32> to vector<96x16xf32>
    %c21 = arith.constant 21 : index
    %c0_34 = arith.constant 0 : index
    %94 = vector.load %arg2[%c21, %c0_34] : memref<104x32xf32, #tpu.memory_space<vmem>>, vector<16x32xf32>
    %cst_35 = arith.constant dense<0.000000e+00> : vector<96x32xf32>
    %95 = tpu.matmul %93, %94, %cst_35 {dimension_numbers = #tpu.dot_dimension_numbers<[1], [0], [0], [1], [0, 0, 1, 1], [], []>} : vector<96x16xf32>, vector<16x32xf32>, vector<96x32xf32> -> vector<96x32xf32>
    %96 = vector.shape_cast %95 : vector<96x32xf32> to vector<4x24x32xf32>
    %97 = vector.extract_strided_slice %96 {offsets = [0, 0, 0], sizes = [4, 16, 32], strides = [1, 1, 1]} : vector<4x24x32xf32> to vector<4x16x32xf32>
    %98 = vector.shape_cast %92 : vector<4x24x16xf32> to vector<96x16xf32>
    %c37 = arith.constant 37 : index
    %c0_36 = arith.constant 0 : index
    %99 = vector.load %arg2[%c37, %c0_36] : memref<104x32xf32, #tpu.memory_space<vmem>>, vector<16x32xf32>
    %cst_37 = arith.constant dense<0.000000e+00> : vector<96x32xf32>
    %100 = tpu.matmul %98, %99, %cst_37 {dimension_numbers = #tpu.dot_dimension_numbers<[1], [0], [0], [1], [0, 0, 1, 1], [], []>} : vector<96x16xf32>, vector<16x32xf32>, vector<96x32xf32> -> vector<96x32xf32>
    %101 = vector.shape_cast %100 : vector<96x32xf32> to vector<4x24x32xf32>
    %102 = vector.extract_strided_slice %101 {offsets = [0, 0, 0], sizes = [4, 16, 32], strides = [1, 1, 1]} : vector<4x24x32xf32> to vector<4x16x32xf32>
    %103 = arith.addf %97, %102 : vector<4x16x32xf32>
    %104 = vector.shape_cast %87 : vector<4x24x16xf32> to vector<96x16xf32>
    %c53 = arith.constant 53 : index
    %c0_38 = arith.constant 0 : index
    %105 = vector.load %arg2[%c53, %c0_38] : memref<104x32xf32, #tpu.memory_space<vmem>>, vector<16x32xf32>
    %cst_39 = arith.constant dense<0.000000e+00> : vector<96x32xf32>
    %106 = tpu.matmul %104, %105, %cst_39 {dimension_numbers = #tpu.dot_dimension_numbers<[1], [0], [0], [1], [0, 0, 1, 1], [], []>} : vector<96x16xf32>, vector<16x32xf32>, vector<96x32xf32> -> vector<96x32xf32>
    %107 = vector.shape_cast %106 : vector<96x32xf32> to vector<4x24x32xf32>
    %108 = vector.extract_strided_slice %107 {offsets = [0, 1, 0], sizes = [4, 16, 32], strides = [1, 1, 1]} : vector<4x24x32xf32> to vector<4x16x32xf32>
    %109 = arith.addf %103, %108 : vector<4x16x32xf32>
    %110 = vector.shape_cast %92 : vector<4x24x16xf32> to vector<96x16xf32>
    %c69 = arith.constant 69 : index
    %c0_40 = arith.constant 0 : index
    %111 = vector.load %arg2[%c69, %c0_40] : memref<104x32xf32, #tpu.memory_space<vmem>>, vector<16x32xf32>
    %cst_41 = arith.constant dense<0.000000e+00> : vector<96x32xf32>
    %112 = tpu.matmul %110, %111, %cst_41 {dimension_numbers = #tpu.dot_dimension_numbers<[1], [0], [0], [1], [0, 0, 1, 1], [], []>} : vector<96x16xf32>, vector<16x32xf32>, vector<96x32xf32> -> vector<96x32xf32>
    %113 = vector.shape_cast %112 : vector<96x32xf32> to vector<4x24x32xf32>
    %114 = vector.extract_strided_slice %113 {offsets = [0, 1, 0], sizes = [4, 16, 32], strides = [1, 1, 1]} : vector<4x24x32xf32> to vector<4x16x32xf32>
    %115 = arith.addf %109, %114 : vector<4x16x32xf32>
    %116 = vector.shape_cast %87 : vector<4x24x16xf32> to vector<96x16xf32>
    %c85 = arith.constant 85 : index
    %c0_42 = arith.constant 0 : index
    %117 = vector.load %arg2[%c85, %c0_42] : memref<104x32xf32, #tpu.memory_space<vmem>>, vector<16x32xf32>
    %cst_43 = arith.constant dense<0.000000e+00> : vector<96x32xf32>
    %118 = tpu.matmul %116, %117, %cst_43 {dimension_numbers = #tpu.dot_dimension_numbers<[1], [0], [0], [1], [0, 0, 1, 1], [], []>} : vector<96x16xf32>, vector<16x32xf32>, vector<96x32xf32> -> vector<96x32xf32>
    %119 = vector.shape_cast %118 : vector<96x32xf32> to vector<4x24x32xf32>
    %120 = vector.extract_strided_slice %119 {offsets = [0, 2, 0], sizes = [4, 16, 32], strides = [1, 1, 1]} : vector<4x24x32xf32> to vector<4x16x32xf32>
    %121 = arith.addf %115, %120 : vector<4x16x32xf32>
    %122 = vector.shape_cast %1 : vector<1x32xf32> to vector<1x1x32xf32>
    %123 = vector.broadcast %122 : vector<1x1x32xf32> to vector<4x16x32xf32>
    %124 = arith.addf %121, %123 : vector<4x16x32xf32>
    %cst_44 = arith.constant 0.000000e+00 : f32
    %125 = vector.broadcast %cst_44 : f32 to vector<4x16x32xf32>
    %126 = arith.maximumf %124, %125 : vector<4x16x32xf32>
    %127 = tpu.iota {dimensions = array<i32: 1>} : vector<4x16x32xi32>
    %c13_i32 = arith.constant 13 : i32
    %128 = vector.broadcast %c13_i32 : i32 to vector<4x16x32xi32>
    %129 = arith.cmpi slt, %127, %128 : vector<4x16x32xi32>
    %cst_45 = arith.constant 0.000000e+00 : f32
    %130 = vector.broadcast %cst_45 : f32 to vector<4x16x32xf32>
    %131 = arith.select %129, %126, %130 : vector<4x16x32xi1>, vector<4x16x32xf32>
    %cst_46 = arith.constant dense<0.000000e+00> : vector<4x32xf32>
    %132 = vector.multi_reduction <add>, %131, %cst_46 [1] : vector<4x16x32xf32> to vector<4x32xf32>
    %cst_47 = arith.constant 0.0769230798 : f32
    %133 = vector.broadcast %cst_47 : f32 to vector<4x32xf32>
    %134 = arith.mulf %132, %133 : vector<4x32xf32>
    %cst_48 = arith.constant dense<0.000000e+00> : vector<1x4xf32>
    %135 = tpu.matmul %2, %134, %cst_48 {dimension_numbers = #tpu.dot_dimension_numbers<[1], [1], [0], [0], [0, 0, 1, 0], [], []>} : vector<1x32xf32>, vector<4x32xf32>, vector<1x4xf32> -> vector<1x4xf32>
    %136 = vector.broadcast %3 : vector<1x1xf32> to vector<1x4xf32>
    %137 = arith.addf %135, %136 : vector<1x4xf32>
    %138 = arith.negf %137 : vector<1x4xf32>
    %139 = math.exp %138 : vector<1x4xf32>
    %cst_49 = arith.constant 1.000000e+00 : f32
    %140 = vector.broadcast %cst_49 : f32 to vector<1x4xf32>
    %141 = arith.addf %140, %139 : vector<1x4xf32>
    %142 = arith.divf %140, %141 : vector<1x4xf32>
    %143 = vector.shape_cast %142 : vector<1x4xf32> to vector<1x1x4xf32>
    %c0_50 = arith.constant 0 : index
    %c0_51 = arith.constant 0 : index
    %c0_52 = arith.constant 0 : index
    %144 = vector.load %arg3[%c0_50, %c0_51, %c0_52] : memref<1x1x4xf32, #tpu.memory_space<vmem>>, vector<1x1x4xf32>
    tpu.vector_store %arg3[%c0_50, %c0_51, %c0_52], %143 {strides = array<i32>} : memref<1x1x4xf32, #tpu.memory_space<vmem>>, vector<1x1x4xf32>,
    return
  }
  func.func @transform_0(%arg0: i32) -> (i32, i32, i32, i32) {
    %c0_i32 = arith.constant 0 : i32
    %c0_i32_0 = arith.constant 0 : i32
    %c0_i32_1 = arith.constant 0 : i32
    %c0_i32_2 = arith.constant 0 : i32
    return %arg0, %c0_i32, %c0_i32_0, %c0_i32_1 : i32, i32, i32, i32
  }
  func.func @transform_1(%arg0: i32) -> (i32, i32) {
    %c0_i32 = arith.constant 0 : i32
    %c0_i32_0 = arith.constant 0 : i32
    %c0_i32_1 = arith.constant 0 : i32
    return %c0_i32, %c0_i32_0 : i32, i32
  }
  func.func @transform_2(%arg0: i32) -> (i32, i32, i32) {
    %c0_i32 = arith.constant 0 : i32
    %c0_i32_0 = arith.constant 0 : i32
    %c0_i32_1 = arith.constant 0 : i32
    return %arg0, %c0_i32, %c0_i32_0 : i32, i32, i32
  }
}

</mosaic_0001>

<bundles_post_ra>
// kernel: tpu_custom_call.1
= control target key start
LH: loop header
LB: loop body
LE: loop exit
PB: predicated region body
PF: predicated region fallthrough
CT: control target
= control target key end

     0   :  { %7 = vsyncpa [#allocation3], 0  ;;  %s3695_s0 = inlined_call_operand.vmem [shape: f32[8,4,32,4], index: 0, kind: input, shape index: {}]   ;;  %s3696_s1 = inlined_call_operand.vmem [shape: f32[104,32], index: 1, kind: input, shape index: {}]   ;;  %s3697_s2 = inlined_call_operand.hbm [shape: f32[2,1,4], index: 2, kind: output, shape index: {}]  }
   0x1   :  { %9 = vsyncpa [#allocation3 + $0x1], 0  ;;  %s2488_s9 = smov 0   ;;  %s2490_s10 = smov 0  }
   0x2   :  { %s2492_s11 = smov 0   ;;  %s2494_s12 = smov 0  }
   0x3 LB: > { %s2509_s13 = sadd.s32 4294967295, %s2470_s12   ;;  %s2117_s14 = sadd.s32 4294967294, %s2470_s12   ;;  %s2470_s12 = sphi %s2494_s12, %s3743_s12   ;;  %s2466_s11 = sphi %s2492_s11, %s3742_s11   ;;  %s2462_s10 = sphi %s2490_s10, %s3741_s10   ;;  %s2458_s9 = sphi %s2488_s9, %s3740_s9  }
   0x4   : > { %s2513_s15 = sadd.s32 1, %s2470_s12   ;;  %s69_s16 = sadd.s32 1, %s2466_s11 }
   0x5   : > { %s66_s17 = ssub.s32 %s2470_s12, %s2513_s15  ;;  %p79_p0 = scmp.ne.s32.totalorder %s2466_s11, %s2462_s10 }
   0x6   : > { %p67_p1 = scmp.eq.s32.totalorder %s66_s17, 0  ;;  %p80_p2 = scmp.eq.s32.totalorder %s2509_s13, 1 }
   0x7   : > { %p85_p3 = scmp.ne.s32.totalorder %s2462_s10, %s2458_s9  ;;  %p86_p4 = scmp.eq.s32.totalorder %s2117_s14, 1 }
   0x8   : > { %s2524_s18 = scalar_select %p67_p1, %s2466_s11, %s69_s16  }
   0x9   : > { %p2526_p5 = por %p80_p2, %p79_p0  ;;  %p2530_p6 = por %p86_p4, %p85_p3 }
   0xa   : > { %p2120_p7 = scmp.ge.s32.totalorder %s2470_s12, 1  ;;  %p117_p8 = scmp.lt.s32.totalorder %s2470_s12, 3 }
   0xc   : > { %p118_p9 = pnand %p2120_p7, %p117_p8 }
   0xe   : > { %121 = sbr.rel (%p118_p9) target bundleno = 990 (0x3de), region = 28 }
  0x13   : > { %v214_v0 = vld [vmem:[%s3696_s1] sm:$0xf]  ;;  %vm264_vm0 = vcmask 1043456   ;;  %v454_v1 = vld [vmem:[%s3696_s1 + $0x8] sm:$0xf]  ;;  %s2121_s25 = sshll.u32 %s2509_s13, 2  ;;  %s2058_s29 = scalar_lea.hbm %s3697_s2, %s2509_s13 }
  0x14   : > { %2124 = vmatpush.msk.msra.mxu0 %vm264_vm0, %v214_v0  ;;  %2360 = vmatpush.msk.msra.mxu1 %vm264_vm0, %v214_v0  ;;  %p140_p10 = scmp.lt.s32.totalorder %s2121_s25, 7  ;;  %v2548_v2 = vld [vmem:[%s3696_s1 + $0xc] sm:$0xf]  ;;  %v329_v3 = vld [vmem:[%s3696_s1 + $0x4] sm:$0xf]  ;;  %vm215_vm1 = vcmask 31744  }
  0x15   : > { %2158 = vmatpush.msk.msra.mxu2 %vm264_vm0, %v454_v1  ;;  %2175 = vmatpush.msk.msra.mxu3 %vm264_vm0, %v2548_v2  ;;  %v704_v36 = vld [vmem:[%s3696_s1 + $0x10] sm:$0xf]  ;;  %vm789_vm2 = vcmask 1046528   ;;  %vm1426_vm3 = vcmask 130048   ;;  %vm1880_vm4 = vcmask 1045504   ;;  %vm1947_vm6 = vcmask 261120  }
  0x16   : > { %s3745_s25 = smov (!%p140_p10, %s2121_s25), 7  ;;  %2141 = vmatpush.msk.msrb.mxu1 %vm264_vm0, %v329_v3  ;;  %2192 = vmatpush.msk.msrb.mxu0 %vm264_vm0, %v704_v36  ;;  %vm1997_vm7 = vcmask 1041409   ;;  %vm1999_vm8 = vcmask 1042434   ;;  %vm2001_vm9 = vcmask 1043459   ;;  %s137_s26 = sand.u32 1, %s2462_s10   ;;  %vm2047_vm13 = vcmask 24576  }
  0x17   : > { %2226 = vmatpush.msk.msrb.mxu2 %vm264_vm0, %v329_v3  ;;  %2243 = vmatpush.msk.msrb.mxu3 %vm264_vm0, %v454_v1  ;;  %s2359_s30 = sshll.u32 %s3745_s25, 7  ;;  %s2062_s4 = sshll.u32 %s2058_s29, 4  ;;  %s2063_s4 = int_to_ptr.hbm [resolvable:$true] %s2062_s4 }
  0x18   : > { %s2562_s5 = scalar_lea.vmem %s3695_s0, %s2359_s30  ;;  %s138_s30 = scalar_lea.vmem [#allocation2], %s137_s26 }
  0x19   : > { %v2565_v4 = vld [vmem:[%s2562_s5] sm:$0xff]  ;;  %v2586_v8 = vld [vmem:[%s2562_s5 + $0x8] sm:$0xff]  ;;  %v2606_v12 = vld [vmem:[%s2562_s5 + $0x10] sm:$0xff]  ;;  %s2060_s3 = sshll.u32 %s138_s30, 4  ;;  %s2050_s13 = scalar_lea.sflag [#allocation3], %s137_s26  ;;  %s2061_s3 = int_to_ptr.vmem [resolvable:$true] %s2060_s3 }
  0x1a   : > { %v2568_v5 = vld [vmem:[%s2562_s5 + $0x180] sm:$0xff]  ;;  %2125 = vmatmul.msk.f32.vlgmr.msra.gmra.mxu0 %vm215_vm1, %v2565_v4  ;;  %v2589_v9 = vld [vmem:[%s2562_s5 + $0x188] sm:$0xff]  ;;  %v2609_v13 = vld [vmem:[%s2562_s5 + $0x190] sm:$0xff]  ;;  %s2428_s14 = scalar_lea.hbm %s3697_s2, 2 }
  0x1b   : > { %v2571_v6 = vld [vmem:[%s2562_s5 + $0x40] sm:$0xff]  ;;  %2137 = vmatmul.msk.f32.vlgmr.msra.gmra.mxu1 %vm215_vm1, %v2568_v5  ;;  %v2592_v10 = vld [vmem:[%s2562_s5 + $0x48] sm:$0xff]  ;;  %v2612_v14 = vld [vmem:[%s2562_s5 + $0x50] sm:$0xff]  ;;  %2260 = vmatpush.msk.msra.mxu0 %vm264_vm0, %v2548_v2 }
  0x1c   : > { %2159 = vmatmul.msk.f32.vlgmr.msra.gmra.mxu2 %vm215_vm1, %v2571_v6  ;;  %2209 = vmatpush.msk.msra.mxu1 %vm264_vm0, %v214_v0  ;;  %v2581_v7 = vld [vmem:[%s2562_s5 + $0x60] sm:$0xff]  ;;  %v2599_v11 = vld [vmem:[%s2562_s5 + $0x68] sm:$0xff]  ;;  %v2619_v15 = vld [vmem:[%s2562_s5 + $0x70] sm:$0xff] }
  0x1d   : > { %2176 = vmatmul.msk.f32.vlgmr.msra.gmra.mxu3 %vm215_vm1, %v2581_v7  ;;  %v2626_v16 = vld [vmem:[%s2562_s5 + $0x18] sm:$0xff]  ;;  %v2646_v20 = vld [vmem:[%s2562_s5 + $0x80] sm:$0xff]  ;;  %v2666_v24 = vld [vmem:[%s2562_s5 + $0x88] sm:$0xff] }
  0x1e   : > { %v2629_v17 = vld [vmem:[%s2562_s5 + $0x198] sm:$0xff]  ;;  %v2649_v21 = vld [vmem:[%s2562_s5 + $0x20] sm:$0xff]  ;;  %v2669_v25 = vld [vmem:[%s2562_s5 + $0x28] sm:$0xff] }
  0x1f   : > { %v2632_v18 = vld [vmem:[%s2562_s5 + $0x58] sm:$0xff]  ;;  %v2652_v22 = vld [vmem:[%s2562_s5 + $0xc0] sm:$0xff]  ;;  %v2672_v26 = vld [vmem:[%s2562_s5 + $0xc8] sm:$0xff] }
  0x20   : > { %v2639_v19 = vld [vmem:[%s2562_s5 + $0x78] sm:$0xff]  ;;  %v2659_v23 = vld [vmem:[%s2562_s5 + $0xe0] sm:$0xff]  ;;  %v2679_v27 = vld [vmem:[%s2562_s5 + $0xe8] sm:$0xff] }
  0x21   : > { %v2686_v28 = vld [vmem:[%s2562_s5 + $0x90] sm:$0xff]  ;;  %v2706_v32 = vld [vmem:[%s2562_s5 + $0x98] sm:$0xff]  ;;  %v2733_v37 = vld [vmem:[%s2562_s5 + $0x100] sm:$0xff] }
  0x22   : > { %2126 = vmatmul.msk.f32.gmra.mxu0 %vm215_vm1, %v2586_v8  ;;  %v2689_v29 = vld [vmem:[%s2562_s5 + $0x30] sm:$0xff]  ;;  %v2709_v33 = vld [vmem:[%s2562_s5 + $0x38] sm:$0xff]  ;;  %v2736_v38 = vld [vmem:[%s2562_s5 + $0xa0] sm:$0xff] }
  0x23   : > { %2138 = vmatmul.msk.f32.gmra.mxu1 %vm215_vm1, %v2589_v9  ;;  %v2692_v30 = vld [vmem:[%s2562_s5 + $0xd0] sm:$0xff]  ;;  %v2712_v34 = vld [vmem:[%s2562_s5 + $0xd8] sm:$0xff]  ;;  %v2739_v39 = vld [vmem:[%s2562_s5 + $0x140] sm:$0xff] }
  0x24   : > { %2160 = vmatmul.msk.f32.gmra.mxu2 %vm215_vm1, %v2592_v10  ;;  %v2699_v31 = vld [vmem:[%s2562_s5 + $0xf0] sm:$0xff]  ;;  %v2719_v35 = vld [vmem:[%s2562_s5 + $0xf8] sm:$0xff]  ;;  %v2746_v40 = vld [vmem:[%s2562_s5 + $0x160] sm:$0xff] }
  0x25   : > { %2177 = vmatmul.msk.f32.gmra.mxu3 %vm215_vm1, %v2599_v11  ;;  %v2753_v41 = vld [vmem:[%s2562_s5 + $0x108] sm:$0xff]  ;;  %v2773_v45 = vld [vmem:[%s2562_s5 + $0x110] sm:$0xff]  ;;  %v2793_v49 = vld [vmem:[%s2562_s5 + $0x118] sm:$0xff] }
  0x26   : > { %v2756_v42 = vld [vmem:[%s2562_s5 + $0xa8] sm:$0xff]  ;;  %v2776_v46 = vld [vmem:[%s2562_s5 + $0xb0] sm:$0xff]  ;;  %v2796_v50 = vld [vmem:[%s2562_s5 + $0xb8] sm:$0xff] }
  0x27   : > { %v2759_v43 = vld [vmem:[%s2562_s5 + $0x148] sm:$0xff]  ;;  %3714 = vst [vmem:[#allocation5_spill] sm:$0xff] %v2776_v46  ;;  %v2779_v47 = vld [vmem:[%s2562_s5 + $0x150] sm:$0xff]  ;;  %v2799_v51 = vld [vmem:[%s2562_s5 + $0x158] sm:$0xff] }
  0x28   : > { %v2766_v44 = vld [vmem:[%s2562_s5 + $0x168] sm:$0xff]  ;;  %v2786_v48 = vld [vmem:[%s2562_s5 + $0x170] sm:$0xff]  ;;  %3715 = vst [vmem:[#allocation6_spill] sm:$0xff] %v2796_v50  ;;  %v2806_v52 = vld [vmem:[%s2562_s5 + $0x178] sm:$0xff] }
  0x29   : > { %v2813_v53 = vld [vmem:[%s2562_s5 + $0x120] sm:$0xff]  ;;  %v2830_v56 = vld [vmem:[%s2562_s5 + $0x128] sm:$0xff]  ;;  %v2847_v59 = vld [vmem:[%s2562_s5 + $0x130] sm:$0xff] }
  0x2a   : > { %2127 = vmatmul.msk.f32.gmra.mxu0 %vm215_vm1, %v2606_v12  ;;  %3716 = vst [vmem:[#allocation7_spill] sm:$0xff] %v2813_v53  ;;  %v2816_v54 = vld [vmem:[%s2562_s5 + $0x1c0] sm:$0xff]  ;;  %v2833_v57 = vld [vmem:[%s2562_s5 + $0x1c8] sm:$0xff]  ;;  %v2850_v60 = vld [vmem:[%s2562_s5 + $0x1d0] sm:$0xff] }
  0x2b   : > { %2139 = vmatmul.msk.f32.gmra.mxu1 %vm215_vm1, %v2609_v13  ;;  %v2823_v55 = vld [vmem:[%s2562_s5 + $0x1e0] sm:$0xff]  ;;  %3717 = vst [vmem:[#allocation8_spill] sm:$0xff] %v2830_v56  ;;  %v2840_v58 = vld [vmem:[%s2562_s5 + $0x1e8] sm:$0xff]  ;;  %v2857_v61 = vld [vmem:[%s2562_s5 + $0x1f0] sm:$0xff] }
  0x2c   : > { %2161 = vmatmul.msk.f32.gmra.mxu2 %vm215_vm1, %v2612_v14  ;;  %3718 = vst [vmem:[#allocation9_spill] sm:$0xff] %v2847_v59  ;;  %v2864_v62 = vld [vmem:[%s2562_s5 + $0x138] sm:$0xff]  ;;  %v2883_v3 = vld [vmem:[%s2562_s5 + $0x1a0] sm:$0xff] }
  0x2d   : > { %2178 = vmatmul.msk.f32.gmra.mxu3 %vm215_vm1, %v2619_v15  ;;  %3719 = vst [vmem:[#allocation10_spill] sm:$0xff] %v2850_v60  ;;  %v2867_v63 = vld [vmem:[%s2562_s5 + $0x1d8] sm:$0xff] }
  0x2e   : > { %3720 = vst [vmem:[#allocation11_spill] sm:$0xff] %v2864_v62  ;;  %v2874_v0 = vld [vmem:[%s2562_s5 + $0x1f8] sm:$0xff] }
  0x2f   : > { %3721 = vst [vmem:[#allocation12_spill] sm:$0xff] %v2867_v63 }
  0x30   : > { %3722 = vst [vmem:[#allocation13_spill] sm:$0xff] %v2883_v3 }
  0x32   : > { %2128 = vmatmul.msk.f32.gmra.mxu0 %vm215_vm1, %v2626_v16 }
  0x33   : > { %2140 = vmatmul.msk.f32.gmra.mxu1 %vm215_vm1, %v2629_v17 }
  0x34   : > { %2162 = vmatmul.msk.f32.gmra.mxu2 %vm215_vm1, %v2632_v18 }
  0x35   : > { %2179 = vmatmul.msk.f32.gmra.mxu3 %vm215_vm1, %v2639_v19 }
  0x3a   : > { %2129 = vmatmul.msk.f32.gmra.mxu0 %vm215_vm1, %v2646_v20 }
  0x3b   : > { %2142 = vmatmul.msk.f32.vlgmr.msrb.gmra.mxu1 %vm215_vm1, %v2649_v21 }
  0x3c   : > { %2163 = vmatmul.msk.f32.gmra.mxu2 %vm215_vm1, %v2652_v22  ;;  %2277 = vmatpush.msk.msrb.mxu1 %vm264_vm0, %v704_v36 }
  0x3d   : > { %2180 = vmatmul.msk.f32.gmra.mxu3 %vm215_vm1, %v2659_v23 }
  0x42   : > { %2130 = vmatmul.msk.f32.gmra.mxu0 %vm215_vm1, %v2666_v24 }
  0x43   : > { %2143 = vmatmul.msk.f32.gmra.mxu1 %vm215_vm1, %v2669_v25 }
  0x44   : > { %2164 = vmatmul.msk.f32.gmra.mxu2 %vm215_vm1, %v2672_v26 }
  0x45   : > { %2181 = vmatmul.msk.f32.gmra.mxu3 %vm215_vm1, %v2679_v27 }
  0x4a   : > { %2131 = vmatmul.msk.f32.gmra.mxu0 %vm215_vm1, %v2686_v28 }
  0x4b   : > { %2144 = vmatmul.msk.f32.gmra.mxu1 %vm215_vm1, %v2689_v29 }
  0x4c   : > { %2165 = vmatmul.msk.f32.gmra.mxu2 %vm215_vm1, %v2692_v30 }
  0x4d   : > { %2182 = vmatmul.msk.f32.gmra.mxu3 %vm215_vm1, %v2699_v31 }
  0x52   : > { %2132 = vmatmul.msk.f32.gmra.mxu0 %vm215_vm1, %v2706_v32 }
  0x53   : > { %2145 = vmatmul.msk.f32.gmra.mxu1 %vm215_vm1, %v2709_v33 }
  0x54   : > { %2166 = vmatmul.msk.f32.gmra.mxu2 %vm215_vm1, %v2712_v34 }
  0x55   : > { %2183 = vmatmul.msk.f32.gmra.mxu3 %vm215_vm1, %v2719_v35 }
  0x5a   : > { %2133 = vmatmul.msk.f32.gmra.mxu0 %vm215_vm1, %v2733_v37 }
  0x5b   : > { %2146 = vmatmul.msk.f32.gmra.mxu1 %vm215_vm1, %v2736_v38 }
  0x5c   : > { %2167 = vmatmul.msk.f32.gmra.mxu2 %vm215_vm1, %v2739_v39 }
  0x5d   : > { %2184 = vmatmul.msk.f32.gmra.mxu3 %vm215_vm1, %v2746_v40 }
  0x62   : > { %2134 = vmatmul.msk.f32.gmra.mxu0 %vm215_vm1, %v2753_v41 }
  0x63   : > { %2147 = vmatmul.msk.f32.gmra.mxu1 %vm215_vm1, %v2756_v42 }
  0x64   : > { %2168 = vmatmul.msk.f32.gmra.mxu2 %vm215_vm1, %v2759_v43 }
  0x65   : > { %2185 = vmatmul.msk.f32.gmra.mxu3 %vm215_vm1, %v2766_v44 }
  0x6a   : > { %2135 = vmatmul.msk.f32.gmra.mxu0 %vm215_vm1, %v2773_v45 }
  0x6b   : > { %2148 = vmatmul.msk.f32.gmra.mxu1 %vm215_vm1, %v2776_v46  ;;  %v2920_v46 = vld [vmem:[%s2562_s5 + $0x1b8] sm:$0xff] }
  0x6c   : > { %2169 = vmatmul.msk.f32.gmra.mxu2 %vm215_vm1, %v2779_v47  ;;  %3726 = vst [vmem:[#allocation17_spill] sm:$0xff] %v2920_v46 }
  0x6d   : > { %2186 = vmatmul.msk.f32.gmra.mxu3 %vm215_vm1, %v2786_v48 }
  0x72   : > { %2136 = vmatmul.msk.f32.gmra.mxu0 %vm215_vm1, %v2793_v49 }
  0x73   : > { %2149 = vmatmul.msk.f32.gmra.mxu1 %vm215_vm1, %v2796_v50  ;;  %v2909_v50 = vld [vmem:[%s2562_s5 + $0x1b0] sm:$0xff] }
  0x74   : > { %2170 = vmatmul.msk.f32.gmra.mxu2 %vm215_vm1, %v2799_v51  ;;  %3725 = vst [vmem:[#allocation16_spill] sm:$0xff] %v2909_v50 }
  0x75   : > { %2187 = vmatmul.msk.f32.gmra.mxu3 %vm215_vm1, %v2806_v52 }
  0x7a   : > { %2193 = vmatmul.msk.f32.vlgmr.msrb.gmra.mxu0 %vm215_vm1, %v2565_v4 }
  0x7b   : > { %2150 = vmatmul.msk.f32.gmra.mxu1 %vm215_vm1, %v2813_v53 }
  0x7c   : > { %2171 = vmatmul.msk.f32.gmra.mxu2 %vm215_vm1, %v2816_v54 }
  0x7d   : > { %2188 = vmatmul.msk.f32.gmra.mxu3 %vm215_vm1, %v2823_v55 }
  0x82   : > { %2194 = vmatmul.msk.f32.gmra.mxu0 %vm215_vm1, %v2586_v8 }
  0x83   : > { %2151 = vmatmul.msk.f32.gmra.mxu1 %vm215_vm1, %v2830_v56  ;;  %v2896_v56 = vld [vmem:[%s2562_s5 + $0x1a8] sm:$0xff]  ;;  %s2422_s5 = sshra.s32 %s2063_s4, 4  ;;  %s2423_s5 = int_to_ptr.hbm [resolvable:$true] %s2422_s5 }
  0x84   : > { %2172 = vmatmul.msk.f32.gmra.mxu2 %vm215_vm1, %v2833_v57  ;;  %3723 = vst [vmem:[#allocation14_spill] sm:$0xff] %v2896_v56  ;;  %s2424_s6 = scalar_lea.hbm %s2423_s5, 1  ;;  %p2429_p0 = scmp.lt.s32.totalorder %s2423_s5, %s3697_s2 }
  0x85   : > { %2189 = vmatmul.msk.f32.gmra.mxu3 %vm215_vm1, %v2840_v58  ;;  %p2425_p11 = scmp.ne.s32.totalorder %s2423_s5, %s2424_s6  ;;  %p2430_p1 = scmp.lt.s32.totalorder %s2428_s14, %s2424_s6 }
  0x87   : > { %p2426_p12 = pnand %p2425_p11, %p2526_p5  ;;  %p2431_p2 = por %p2430_p1, %p2429_p0 }
  0x89   : > { %p2427_p13 = pneg %p2426_p12 }
  0x8a   : > { %2195 = vmatmul.msk.f32.gmra.mxu0 %vm215_vm1, %v2606_v12 }
  0x8b   : > { %2152 = vmatmul.msk.f32.gmra.mxu1 %vm215_vm1, %v2847_v59  ;;  %p2432_p3 = pnand %p2431_p2, %p2427_p13 }
  0x8c   : > { %2173 = vmatmul.msk.f32.gmra.mxu2 %vm215_vm1, %v2850_v60 }
  0x8d   : > { %2190 = vmatmul.msk.f32.gmra.mxu3 %vm215_vm1, %v2857_v61 }
  0x92   : > { %2196 = vmatmul.msk.f32.gmra.mxu0 %vm215_vm1, %v2626_v16 }
  0x93   : > { %2153 = vmatmul.msk.f32.gmra.mxu1 %vm215_vm1, %v2864_v62 }
  0x94   : > { %2174 = vmatmul.msk.f32.gmra.mxu2 %vm215_vm1, %v2867_v63 }
  0x95   : > { %2191 = vmatmul.msk.f32.gmra.mxu3 %vm215_vm1, %v2874_v0 }
  0x97   : > { %v285_v1 = vpop.f32.mrf.mxu0 }
  0x98   : > { %v2880_v2 = vpop.f32.mrf.mxu1 }
  0x9a   : > { %2197 = vmatmul.msk.f32.gmra.mxu0 %vm215_vm1, %v2646_v20 }
  0x9b   : > { %2154 = vmatmul.msk.f32.gmra.mxu1 %vm215_vm1, %v2883_v3 }
  0x9c   : > { %2227 = vmatmul.msk.f32.vlgmr.msrb.gmra.mxu2 %vm215_vm1, %v2581_v7 }
  0x9d   : > { %2244 = vmatmul.msk.f32.vlgmr.msrb.gmra.mxu3 %vm215_vm1, %v2565_v4 }
  0x9f   : > { %v523_v36 = vpop.f32.mrf.mxu2  ;;  %v288_v62 = vpop.f32.mrf.mxu0 }
  0xa0   : > { %v2893_v59 = vpop.f32.mrf.mxu1  ;;  %v648_v53 = vpop.f32.mrf.mxu3 }
  0xa2   : > { %2198 = vmatmul.msk.f32.gmra.mxu0 %vm215_vm1, %v2666_v24 }
  0xa3   : > { %2155 = vmatmul.msk.f32.gmra.mxu1 %vm215_vm1, %v2896_v56 }
  0xa4   : > { %2228 = vmatmul.msk.f32.gmra.mxu2 %vm215_vm1, %v2599_v11 }
  0xa5   : > { %2245 = vmatmul.msk.f32.gmra.mxu3 %vm215_vm1, %v2586_v8 }
  0xa7   : > { %v526_v4 = vpop.f32.mrf.mxu2  ;;  %v291_v7 = vpop.f32.mrf.mxu0 }
  0xa8   : > { %v2906_v3 = vpop.f32.mrf.mxu1  ;;  %v651_v63 = vpop.f32.mrf.mxu3 }
  0xa9   : > { %3724 = vst [vmem:[#allocation15_spill] sm:$0xff] %v2906_v3 }
  0xaa   : > { %2199 = vmatmul.msk.f32.gmra.mxu0 %vm215_vm1, %v2686_v28 }
  0xab   : > { %2156 = vmatmul.msk.f32.gmra.mxu1 %vm215_vm1, %v2909_v50 }
  0xac   : > { %2229 = vmatmul.msk.f32.gmra.mxu2 %vm215_vm1, %v2619_v15 }
  0xad   : > { %2246 = vmatmul.msk.f32.gmra.mxu3 %vm215_vm1, %v2606_v12 }
  0xaf   : > { %v529_v8 = vpop.f32.mrf.mxu2  ;;  %v294_v11 = vpop.f32.mrf.mxu0 }
  0xb0   : > { %v327_v56 = vpop.f32.mrf.mxu1  ;;  %v654_v60 = vpop.f32.mrf.mxu3 }
  0xb2   : > { %2200 = vmatmul.msk.f32.gmra.mxu0 %vm215_vm1, %v2706_v32 }
  0xb3   : > { %2157 = vmatmul.msk.f32.gmra.mxu1 %vm215_vm1, %v2920_v46 }
  0xb4   : > { %2230 = vmatmul.msk.f32.gmra.mxu2 %vm215_vm1, %v2639_v19 }
  0xb5   : > { %2247 = vmatmul.msk.f32.gmra.mxu3 %vm215_vm1, %v2626_v16 }
  0xb7   : > { %v532_v15 = vpop.f32.mrf.mxu2  ;;  %v296_v12 = vpop.f32.mrf.mxu0 }
  0xb8   : > { %v398_v50 = vpop.f32.mrf.mxu1  ;;  %v657_v56 = vpop.f32.mrf.mxu3 }
  0xb9   : > { %v442_v11 = vadd.f32 %v398_v50, %v285_v1 }
  0xba   : > { %2201 = vmatmul.msk.f32.gmra.mxu0 %vm215_vm1, %v2733_v37 }
  0xbb   : > { %v567_v3 = vadd.f32 %v523_v36, %v442_v11  ;;  %2210 = vmatmul.msk.f32.vlgmr.msra.gmra.mxu1 %vm215_vm1, %v2571_v6 }
  0xbc   : > { %2231 = vmatmul.msk.f32.gmra.mxu2 %vm215_vm1, %v2659_v23 }
  0xbd   : > { %v2936_v46 = vadd.f32 %v648_v53, %v567_v3  ;;  %2248 = vmatmul.msk.f32.gmra.mxu3 %vm215_vm1, %v2646_v20 }
  0xbf   : > { %v534_v16 = vpop.f32.mrf.mxu2  ;;  %v299_v19 = vpop.f32.mrf.mxu0 }
  0xc0   : > { %v401_v15 = vpop.f32.mrf.mxu1  ;;  %v659_v1 = vpop.f32.mrf.mxu3 }
  0xc1   : > { %v443_v50 = vadd.f32 %v401_v15, %v288_v62 }
  0xc2   : > { %2202 = vmatmul.msk.f32.gmra.mxu0 %vm215_vm1, %v2753_v41 }
  0xc3   : > { %v568_v36 = vadd.f32 %v526_v4, %v443_v50  ;;  %2211 = vmatmul.msk.f32.gmra.mxu1 %vm215_vm1, %v2592_v10 }
  0xc4   : > { %2232 = vmatmul.msk.f32.gmra.mxu2 %vm215_vm1, %v2679_v27 }
  0xc5   : > { %v2946_v23 = vadd.f32 %v651_v63, %v568_v36  ;;  %2249 = vmatmul.msk.f32.gmra.mxu3 %vm215_vm1, %v2666_v24 }
  0xc7   : > { %v537_v20 = vpop.f32.mrf.mxu2  ;;  %v302_v53 = vpop.f32.mrf.mxu0 }
  0xc8   : > { %v404_v3 = vpop.f32.mrf.mxu1  ;;  %v662_v11 = vpop.f32.mrf.mxu3 }
  0xc9   : > { %v444_v62 = vadd.f32 %v404_v3, %v291_v7 }
  0xca   : > { %2203 = vmatmul.msk.f32.gmra.mxu0 %vm215_vm1, %v2773_v45 }
  0xcb   : > { %v569_v4 = vadd.f32 %v529_v8, %v444_v62  ;;  %2212 = vmatmul.msk.f32.gmra.mxu1 %vm215_vm1, %v2612_v14 }
  0xcc   : > { %2233 = vmatmul.msk.f32.gmra.mxu2 %vm215_vm1, %v2699_v31 }
  0xcd   : > { %v2956_v27 = vadd.f32 %v654_v60, %v569_v4  ;;  %2250 = vmatmul.msk.f32.gmra.mxu3 %vm215_vm1, %v2686_v28 }
  0xcf   : > { %v540_v24 = vpop.f32.mrf.mxu2  ;;  %v305_v63 = vpop.f32.mrf.mxu0 }
  0xd0   : > { %v407_v56 = vpop.f32.mrf.mxu1  ;;  %v665_v7 = vpop.f32.mrf.mxu3 }
  0xd2   : > { %2204 = vmatmul.msk.f32.gmra.mxu0 %vm215_vm1, %v2793_v49 }
  0xd3   : > { %2213 = vmatmul.msk.f32.gmra.mxu1 %vm215_vm1, %v2632_v18 }
  0xd4   : > { %2234 = vmatmul.msk.f32.gmra.mxu2 %vm215_vm1, %v2719_v35 }
  0xd5   : > { %2251 = vmatmul.msk.f32.gmra.mxu3 %vm215_vm1, %v2706_v32 }
  0xd7   : > { %v543_v31 = vpop.f32.mrf.mxu2  ;;  %v307_v60 = vpop.f32.mrf.mxu0 }
  0xd8   : > { %v409_v8 = vpop.f32.mrf.mxu1  ;;  %v668_v15 = vpop.f32.mrf.mxu3 }
  0xd9   : > { %v445_v28 = vadd.f32 %v409_v8, %v296_v12 }
  0xda   : > { %2205 = vmatmul.msk.f32.gmra.mxu0 %vm215_vm1, %v2568_v5 }
  0xdb   : > { %v570_v50 = vadd.f32 %v534_v16, %v445_v28  ;;  %2214 = vmatmul.msk.f32.gmra.mxu1 %vm215_vm1, %v2652_v22  ;;  %v1424_v28 = vld [vmem:[%s3696_s1 + $0x15] sm:$0xff] }
  0xdc   : > { %2235 = vmatmul.msk.f32.gmra.mxu2 %vm215_vm1, %v2746_v40 }
  0xdd   : > { %v2974_v36 = vadd.f32 %v659_v1, %v570_v50  ;;  %2252 = vmatmul.msk.f32.gmra.mxu3 %vm215_vm1, %v2733_v37 }
  0xdf   : > { %v545_v32 = vpop.f32.mrf.mxu2  ;;  %v310_v35 = vpop.f32.mrf.mxu0 }
  0xe0   : > { %v412_v3 = vpop.f32.mrf.mxu1  ;;  %v2978_v62 = vpop.f32.mrf.mxu3 }
  0xe1   : > { %v446_v12 = vadd.f32 %v412_v3, %v299_v19 }
  0xe2   : > { %2206 = vmatmul.msk.f32.gmra.mxu0 %vm215_vm1, %v2589_v9 }
  0xe3   : > { %v571_v16 = vadd.f32 %v537_v20, %v446_v12  ;;  %2215 = vmatmul.msk.f32.gmra.mxu1 %vm215_vm1, %v2672_v26 }
  0xe4   : > { %2236 = vmatmul.msk.f32.gmra.mxu2 %vm215_vm1, %v2766_v44 }
  0xe5   : > { %v2986_v40 = vadd.f32 %v662_v11, %v571_v16  ;;  %2253 = vmatmul.msk.f32.gmra.mxu3 %vm215_vm1, %v2753_v41 }
  0xe7   : > { %v548_v37 = vpop.f32.mrf.mxu2  ;;  %v313_v1 = vpop.f32.mrf.mxu0 }
  0xe8   : > { %v415_v19 = vpop.f32.mrf.mxu1  ;;  %v2990_v63 = vpop.f32.mrf.mxu3 }
  0xe9   : > { %v447_v4 = vadd.f32 %v415_v19, %v302_v53 }
  0xea   : > { %2207 = vmatmul.msk.f32.gmra.mxu0 %vm215_vm1, %v2609_v13 }
  0xeb   : > { %v572_v20 = vadd.f32 %v540_v24, %v447_v4  ;;  %2216 = vmatmul.msk.f32.gmra.mxu1 %vm215_vm1, %v2692_v30 }
  0xec   : > { %2237 = vmatmul.msk.f32.gmra.mxu2 %vm215_vm1, %v2786_v48 }
  0xed   : > { %v2998_v44 = vadd.f32 %v665_v7, %v572_v20  ;;  %2254 = vmatmul.msk.f32.gmra.mxu3 %vm215_vm1, %v2773_v45  ;;  %v1425_v7 = vld [vmem:[%s3696_s1 + $0x1d] sm:$0xff] }
  0xee   : > { %1477 = vmatpush.msra.mxu2 %v1425_v7 }
  0xef   : > { %v551_v41 = vpop.f32.mrf.mxu2  ;;  %v316_v11 = vpop.f32.mrf.mxu0 }
  0xf0   : > { %v418_v53 = vpop.f32.mrf.mxu1  ;;  %v3002_v56 = vpop.f32.mrf.mxu3  ;;  %1478 = vmatpush.msra.mxu2 %v1424_v28 }
  0xf2   : > { %2208 = vmatmul.msk.f32.gmra.mxu0 %vm215_vm1, %v2629_v17 }
  0xf3   : > { %2217 = vmatmul.msk.f32.gmra.mxu1 %vm215_vm1, %v2712_v34 }
  0xf4   : > { %2238 = vmatmul.msk.f32.gmra.mxu2 %vm215_vm1, %v2806_v52 }
  0xf5   : > { %2255 = vmatmul.msk.f32.gmra.mxu3 %vm215_vm1, %v2793_v49 }
  0xf7   : > { %v554_v48 = vpop.f32.mrf.mxu2  ;;  %v725_v45 = vpop.f32.mrf.mxu0 }
  0xf8   : > { %v420_v24 = vpop.f32.mrf.mxu1  ;;  %v679_v8 = vpop.f32.mrf.mxu3  ;;  %v790_v16 = vrot.slane %v725_v45, 1 }
  0xf9   : > { %v448_v31 = vadd.f32 %v420_v24, %v307_v60 }
  0xfa   : > { %2261 = vmatmul.msk.f32.vlgmr.msra.gmra.mxu0 %vm215_vm1, %v2649_v21 }
  0xfb   : > { %v3018_v15 = vadd.f32 %v545_v32, %v448_v31  ;;  %2218 = vmatmul.msk.f32.gmra.mxu1 %vm215_vm1, %v2739_v39 }
  0xfc   : > { %2239 = vmatmul.msk.f32.gmra.mxu2 %vm215_vm1, %v2823_v55 }
  0xfd   : > { %2256 = vmatmul.msk.f32.gmra.mxu3 %vm215_vm1, %v2568_v5 }
  0xff   : > { %v556_v49 = vpop.f32.mrf.mxu2  ;;  %v728_v60 = vpop.f32.mrf.mxu0 }
 0x100   : > { %v423_v52 = vpop.f32.mrf.mxu1  ;;  %v3028_v3 = vpop.f32.mrf.mxu3 }
 0x101   : > { %v449_v50 = vadd.f32 %v423_v52, %v310_v35 }
 0x102   : > { %2262 = vmatmul.msk.f32.gmra.mxu0 %vm215_vm1, %v2669_v25 }
 0x103   : > { %v3030_v32 = vadd.f32 %v548_v37, %v449_v50  ;;  %2219 = vmatmul.msk.f32.gmra.mxu1 %vm215_vm1, %v2759_v43  ;;  %v791_v37 = vrot.slane %v728_v60, 1 }
 0x104   : > { %2240 = vmatmul.msk.f32.gmra.mxu2 %vm215_vm1, %v2840_v58 }
 0x105   : > { %2257 = vmatmul.msk.f32.gmra.mxu3 %vm215_vm1, %v2589_v9  ;;  %v792_v9 = vsel %vm789_vm2, %v790_v16, %v791_v37 }
 0x106   : > { %v830_v20 = vadd.f32 %v792_v9, %v2936_v46 }
 0x107   : > { %v559_v5 = vpop.f32.mrf.mxu2  ;;  %v731_v55 = vpop.f32.mrf.mxu0 }
 0x108   : > { %v426_v21 = vpop.f32.mrf.mxu1  ;;  %v3040_v12 = vpop.f32.mrf.mxu3 }
 0x109   : > { %v450_v35 = vadd.f32 %v426_v21, %v313_v1 }
 0x10a   : > { %2263 = vmatmul.msk.f32.gmra.mxu0 %vm215_vm1, %v2689_v29  ;;  %v3059_v29 = vld [vmem:[%s3696_s1 + $0x14] ss:$0 sm:$0xff] }
 0x10b   : > { %v3042_v19 = vadd.f32 %v551_v41, %v450_v35  ;;  %2220 = vmatmul.msk.f32.gmra.mxu1 %vm215_vm1, %v2779_v47  ;;  %v793_v41 = vrot.slane %v731_v55, 1 }
 0x10c   : > { %2241 = vmatmul.msk.f32.gmra.mxu2 %vm215_vm1, %v2857_v61 }
 0x10d   : > { %2258 = vmatmul.msk.f32.gmra.mxu3 %vm215_vm1, %v2609_v13  ;;  %v1376_v13 = vadd.f32 %v3059_v29, %v830_v20  ;;  %v794_v46 = vsel %vm789_vm2, %v791_v37, %v793_v41  ;;  %v3729_v20 = vld [vmem:[#allocation5_spill] sm:$0xff] }
 0x10f   : > { %v562_v25 = vpop.f32.mrf.mxu2  ;;  %v734_v1 = vpop.f32.mrf.mxu0  ;;  %v3072_v45 = vmax.f32 %v1376_v13, 0.0 }
 0x110   : > { %v429_v58 = vpop.f32.mrf.mxu1  ;;  %v3053_v4 = vpop.f32.mrf.mxu3  ;;  %v795_v7 = vrot.slane %v734_v1, 1  ;;  %v3728_v1 = vld [vmem:[#allocation10_spill] sm:$0xff] }
 0x112   : > { %2264 = vmatmul.msk.f32.gmra.mxu0 %vm215_vm1, %v2709_v33  ;;  %v831_v33 = vadd.f32 %v794_v46, %v2946_v23 }
 0x113   : > { %2221 = vmatmul.msk.f32.gmra.mxu1 %vm215_vm1, %v2799_v51 }
 0x114   : > { %2242 = vmatmul.msk.f32.gmra.mxu2 %vm215_vm1, %v2874_v0 }
 0x115   : > { %2259 = vmatmul.msk.f32.gmra.mxu3 %vm215_vm1, %v2629_v17  ;;  %v1377_v17 = vadd.f32 %v3059_v29, %v831_v33 }
 0x117   : > { %v565_v61 = vpop.f32.mrf.mxu2  ;;  %v737_v53 = vpop.f32.mrf.mxu0  ;;  %v3089_v52 = vmax.f32 %v1377_v17, 0.0 }
 0x118   : > { %v431_v11 = vpop.f32.mrf.mxu1  ;;  %v690_v24 = vpop.f32.mrf.mxu3  ;;  %v797_v60 = vrot.slane %v737_v53, 1 }
 0x119   : > { %v451_v48 = vadd.f32 %v431_v11, %v2880_v2  ;;  %v796_v2 = vsel %vm789_vm2, %v793_v41, %v795_v7  ;;  %v3731_v24 = vld [vmem:[#allocation6_spill] sm:$0xff] }
 0x11a   : > { %2265 = vmatmul.msk.f32.gmra.mxu0 %vm215_vm1, %v2736_v38 }
 0x11b   : > { %v3075_v0 = vadd.f32 %v556_v49, %v451_v48  ;;  %2222 = vmatmul.msk.f32.gmra.mxu1 %vm215_vm1, %v2816_v54  ;;  %v832_v49 = vadd.f32 %v796_v2, %v2956_v27  ;;  %v3730_v48 = vld [vmem:[#allocation12_spill] sm:$0xff] }
 0x11c   : > { %2294 = vmatmul.msk.f32.vlgmr.msra.gmra.mxu2 %vm1426_vm3, %v3072_v45 }
 0x11d   : > { %v1378_v21 = vadd.f32 %v3059_v29, %v832_v49 }
 0x11f   : > { %v3085_v31 = vpop.f32.mrf.mxu2  ;;  %v740_v23 = vpop.f32.mrf.mxu0  ;;  %v3105_v9 = vmax.f32 %v1378_v21, 0.0 }
 0x120   : > { %v434_v8 = vpop.f32.mrf.mxu1  ;;  %v798_v38 = vrot.slane %v740_v23, 1 }
 0x121   : > { %v452_v28 = vadd.f32 %v434_v8, %v2893_v59 }
 0x122   : > { %2266 = vmatmul.msk.f32.gmra.mxu0 %vm215_vm1, %v2756_v42  ;;  %v799_v59 = vsel %vm789_vm2, %v797_v60, %v798_v38 }
 0x123   : > { %v3091_v50 = vadd.f32 %v559_v5, %v452_v28  ;;  %2223 = vmatmul.msk.f32.gmra.mxu1 %vm215_vm1, %v2833_v57  ;;  %v3727_v5 = vld [vmem:[#allocation15_spill] sm:$0xff]  ;;  %v833_v37 = vadd.f32 %v799_v59, %v2974_v36 }
 0x124   : > { %2295 = vmatmul.msk.f32.gmra.mxu2 %vm1426_vm3, %v3089_v52  ;;  %v3732_v28 = vld [vmem:[#allocation7_spill] sm:$0xff] }
 0x125   : > { %v1379_v41 = vadd.f32 %v3059_v29, %v833_v37 }
 0x127   : > { %v3101_v27 = vpop.f32.mrf.mxu2  ;;  %v743_v35 = vpop.f32.mrf.mxu0  ;;  %v3120_v11 = vmax.f32 %v1379_v41, 0.0 }
 0x128   : > { %v437_v55 = vpop.f32.mrf.mxu1  ;;  %v800_v42 = vrot.slane %v743_v35, 1 }
 0x129   : > { %v453_v16 = vadd.f32 %v437_v55, %v3727_v5  ;;  %v698_v55 = vadd.f32 %v2978_v62, %v3018_v15 }
 0x12a   : > { %2267 = vmatmul.msk.f32.gmra.mxu0 %vm215_vm1, %v3729_v20  ;;  %v801_v13 = vsel %vm789_vm2, %v798_v38, %v800_v42 }
 0x12b   : > { %v3107_v58 = vadd.f32 %v562_v25, %v453_v16  ;;  %2224 = vmatmul.msk.f32.gmra.mxu1 %vm215_vm1, %v3728_v1  ;;  %v834_v25 = vadd.f32 %v801_v13, %v2986_v40  ;;  %v699_v13 = vadd.f32 %v2990_v63, %v3030_v32  ;;  %v700_v32 = vadd.f32 %v3002_v56, %v3042_v19  ;;  %v1814_v56 = vld [vmem:[%s3696_s1 + $0x5d] sm:$0xff] }
 0x12c   : > { %2296 = vmatmul.msk.f32.gmra.mxu2 %vm1426_vm3, %v3105_v9  ;;  %1829 = vmatpush.msrb.mxu0 %v1814_v56  ;;  %v3736_v19 = vld [vmem:[#allocation13_spill] sm:$0xff] }
 0x12d   : > { %v1380_v33 = vadd.f32 %v3059_v29, %v834_v25  ;;  %v3739_v56 = vld [vmem:[#allocation17_spill] sm:$0xff] }
 0x12f   : > { %v3117_v46 = vpop.f32.mrf.mxu2  ;;  %v746_v61 = vpop.f32.mrf.mxu0  ;;  %v3133_v23 = vmax.f32 %v1380_v33, 0.0 }
 0x130   : > { %v440_v36 = vpop.f32.mrf.mxu1  ;;  %v802_v53 = vrot.slane %v746_v61, 1 }
 0x132   : > { %2268 = vmatmul.msk.f32.gmra.mxu0 %vm215_vm1, %v3731_v24  ;;  %v803_v7 = vsel %vm789_vm2, %v800_v42, %v802_v53 }
 0x133   : > { %2225 = vmatmul.msk.f32.gmra.mxu1 %vm215_vm1, %v3730_v48  ;;  %v835_v40 = vadd.f32 %v803_v7, %v2998_v44 }
 0x134   : > { %2297 = vmatmul.msk.f32.gmra.mxu2 %vm1426_vm3, %v3120_v11 }
 0x135   : > { %v1381_v49 = vadd.f32 %v3059_v29, %v835_v40 }
 0x137   : > { %v929_v17 = vpop.f32.mrf.mxu2  ;;  %v749_v2 = vpop.f32.mrf.mxu0  ;;  %v3148_v35 = vmax.f32 %v1381_v49, 0.0 }
 0x138   : > { %v3130_v8 = vpop.f32.mrf.mxu1  ;;  %v804_v60 = vrot.slane %v749_v2, 1  ;;  %v3735_v2 = vld [vmem:[#allocation11_spill] sm:$0xff] }
 0x13a   : > { %2269 = vmatmul.msk.f32.gmra.mxu0 %vm215_vm1, %v3732_v28 }
 0x13b   : > { %2278 = vmatmul.msk.f32.vlgmr.msrb.gmra.mxu1 %vm215_vm1, %v2571_v6  ;;  %v3733_v6 = vld [vmem:[#allocation8_spill] sm:$0xff] }
 0x13c   : > { %2298 = vmatmul.msk.f32.gmra.mxu2 %vm1426_vm3, %v3133_v23 }
 0x13f   : > { %v3142_v38 = vpop.f32.mrf.mxu2  ;;  %v752_v21 = vpop.f32.mrf.mxu0 }
 0x140   : > { %v3144_v59 = vpop.f32.mrf.mxu1  ;;  %v805_v44 = vrot.slane %v752_v21, 1 }
 0x142   : > { %v806_v5 = vsel %vm789_vm2, %v804_v60, %v805_v44  ;;  %2270 = vmatmul.msk.f32.gmra.mxu0 %vm215_vm1, %v3733_v6 }
 0x143   : > { %2279 = vmatmul.msk.f32.gmra.mxu1 %vm215_vm1, %v2592_v10  ;;  %v836_v16 = vadd.f32 %v806_v5, %v698_v55  ;;  %v3734_v10 = vld [vmem:[#allocation9_spill] sm:$0xff] }
 0x144   : > { %2299 = vmatmul.msk.f32.gmra.mxu2 %vm1426_vm3, %v3148_v35  ;;  %v1608_v5 = vld [vmem:[%s3696_s1 + $0x3d] sm:$0xff] }
 0x145   : > { %v1382_v37 = vadd.f32 %v3059_v29, %v836_v16  ;;  %1623 = vmatpush.msrb.mxu2 %v1608_v5 }
 0x147   : > { %v3158_v42 = vpop.f32.mrf.mxu2  ;;  %v755_v20 = vpop.f32.mrf.mxu0  ;;  %v3162_v15 = vmax.f32 %v1382_v37, 0.0 }
 0x148   : > { %v3160_v62 = vpop.f32.mrf.mxu1  ;;  %v807_v41 = vrot.slane %v755_v20, 1  ;;  %v701_v20 = vadd.f32 %v3028_v3, %v3075_v0  ;;  %v702_v3 = vadd.f32 %v3040_v12, %v3091_v50  ;;  %v703_v50 = vadd.f32 %v3053_v4, %v3107_v58 }
 0x14a   : > { %v808_v36 = vsel %vm789_vm2, %v805_v44, %v807_v41  ;;  %2271 = vmatmul.msk.f32.gmra.mxu0 %vm215_vm1, %v3734_v10 }
 0x14b   : > { %2280 = vmatmul.msk.f32.gmra.mxu1 %vm215_vm1, %v2612_v14  ;;  %v837_v61 = vadd.f32 %v808_v36, %v699_v13  ;;  %v3737_v13 = vld [vmem:[#allocation14_spill] sm:$0xff] }
 0x14c   : > { %2300 = vmatmul.msk.f32.gmra.mxu2 %vm1426_vm3, %v3162_v15 }
 0x14d   : > { %v1383_v25 = vadd.f32 %v3059_v29, %v837_v61 }
 0x14f   : > { %v3174_v53 = vpop.f32.mrf.mxu2  ;;  %v758_v24 = vpop.f32.mrf.mxu0  ;;  %v3176_v7 = vmax.f32 %v1383_v25, 0.0 }
 0x150   : > { %v868_v33 = vpop.f32.mrf.mxu1  ;;  %v809_v63 = vrot.slane %v758_v24, 1 }
 0x152   : > { %v810_v17 = vsel %vm789_vm2, %v807_v41, %v809_v63  ;;  %2272 = vmatmul.msk.f32.gmra.mxu0 %vm215_vm1, %v3735_v2 }
 0x153   : > { %2281 = vmatmul.msk.f32.gmra.mxu1 %vm215_vm1, %v2632_v18  ;;  %v838_v14 = vadd.f32 %v810_v17, %v700_v32  ;;  %v1813_v18 = vld [vmem:[%s3696_s1 + $0x55] sm:$0xff] }
 0x154   : > { %2301 = vmatmul.msk.f32.gmra.mxu2 %vm1426_vm3, %v3176_v7  ;;  %1830 = vmatpush.msrb.mxu0 %v1813_v18  ;;  %v3738_v32 = vld [vmem:[#allocation16_spill] sm:$0xff] }
 0x155   : > { %v1384_v40 = vadd.f32 %v3059_v29, %v838_v14 }
 0x157   : > { %v940_v28 = vpop.f32.mrf.mxu2  ;;  %v761_v49 = vpop.f32.mrf.mxu0  ;;  %v3190_v21 = vmax.f32 %v1384_v40, 0.0 }
 0x158   : > { %v3188_v60 = vpop.f32.mrf.mxu1  ;;  %v811_v44 = vrot.slane %v761_v49, 1 }
 0x15a   : > { %2273 = vmatmul.msk.f32.gmra.mxu0 %vm215_vm1, %v3736_v19 }
 0x15b   : > { %2282 = vmatmul.msk.f32.gmra.mxu1 %vm215_vm1, %v2652_v22  ;;  %v1607_v22 = vld [vmem:[%s3696_s1 + $0x35] sm:$0xff] }
 0x15c   : > { %2302 = vmatmul.msk.f32.gmra.mxu2 %vm1426_vm3, %v3190_v21 }
 0x15d   : > { %1624 = vmatpush.msrb.mxu2 %v1607_v22 }
 0x15f   : > { %v3204_v55 = vpop.f32.mrf.mxu2  ;;  %v764_v6 = vpop.f32.mrf.mxu0 }
 0x160   : > { %v3209_v16 = vpop.f32.mrf.mxu1  ;;  %v812_v37 = vrot.slane %v764_v6, 1 }
 0x162   : > { %v813_v41 = vsel %vm789_vm2, %v811_v44, %v812_v37  ;;  %2274 = vmatmul.msk.f32.gmra.mxu0 %vm215_vm1, %v3737_v13 }
 0x163   : > { %2283 = vmatmul.msk.f32.gmra.mxu1 %vm215_vm1, %v2672_v26  ;;  %v839_v36 = vadd.f32 %v813_v41, %v701_v20 }
 0x165   : > { %v1385_v10 = vadd.f32 %v3059_v29, %v839_v36 }
 0x167   : > { %v945_v61 = vpop.f32.mrf.mxu2  ;;  %v767_v25 = vpop.f32.mrf.mxu0  ;;  %v3224_v33 = vmax.f32 %v1385_v10, 0.0 }
 0x168   : > { %v3222_v24 = vpop.f32.mrf.mxu1  ;;  %v814_v63 = vrot.slane %v767_v25, 1 }
 0x169   : > { %2303 = vmatmul.msk.f32.gmra.mxu2 %vm1426_vm3, %v3224_v33 }
 0x16a   : > { %v815_v0 = vsel %vm789_vm2, %v812_v37, %v814_v63  ;;  %2275 = vmatmul.msk.f32.gmra.mxu0 %vm215_vm1, %v3738_v32 }
 0x16b   : > { %2284 = vmatmul.msk.f32.gmra.mxu1 %vm215_vm1, %v2692_v30  ;;  %v840_v26 = vadd.f32 %v815_v0, %v702_v3 }
 0x16d   : > { %v1386_v17 = vadd.f32 %v3059_v29, %v840_v26 }
 0x16f   : > { %v948_v2 = vpop.f32.mrf.mxu2  ;;  %v770_v14 = vpop.f32.mrf.mxu0  ;;  %v3236_v28 = vmax.f32 %v1386_v17, 0.0 }
 0x170   : > { %v879_v40 = vpop.f32.mrf.mxu1  ;;  %v816_v12 = vrot.slane %v770_v14, 1 }
 0x171   : > { %2304 = vmatmul.msk.f32.gmra.mxu2 %vm1426_vm3, %v3236_v28 }
 0x172   : > { %v817_v49 = vsel %vm789_vm2, %v814_v63, %v816_v12  ;;  %2276 = vmatmul.msk.f32.gmra.mxu0 %vm215_vm1, %v3739_v56 }
 0x173   : > { %2285 = vmatmul.msk.f32.gmra.mxu1 %vm215_vm1, %v2712_v34  ;;  %v841_v30 = vadd.f32 %v817_v49, %v703_v50 }
 0x175   : > { %v1387_v18 = vadd.f32 %v3059_v29, %v841_v30 }
 0x177   : > { %v951_v19 = vpop.f32.mrf.mxu2  ;;  %v3250_v5 = vpop.f32.mrf.mxu0  ;;  %v3252_v4 = vmax.f32 %v1387_v18, 0.0 }
 0x178   : > { %v3248_v44 = vpop.f32.mrf.mxu1 }
 0x179   : > { %2305 = vmatmul.msk.f32.gmra.mxu2 %vm1426_vm3, %v3252_v4 }
 0x17a   : > { %2342 = vmatmul.msk.f32.vlgmr.msrb.gmra.mxu0 %vm1426_vm3, %v3072_v45 }
 0x17b   : > { %2286 = vmatmul.msk.f32.gmra.mxu1 %vm215_vm1, %v2739_v39 }
 0x17f   : > { %v953_v34 = vpop.f32.mrf.mxu2  ;;  %v3260_v6 = vpop.f32.mrf.mxu0 }
 0x180   : > { %v884_v58 = vpop.f32.mrf.mxu1  ;;  %v1191_v30 = vrot.slane %v3260_v6, 1 }
 0x181   : > { %v3262_v37 = vadd.f32 %v945_v61, %v884_v58  ;;  %2318 = vmatmul.msk.f32.vlgmr.msrb.gmra.mxu2 %vm1426_vm3, %v3072_v45  ;;  %v993_v45 = vpop.f32.mrf.mxu3 }
 0x182   : > { %2343 = vmatmul.msk.f32.gmra.mxu0 %vm1426_vm3, %v3089_v52  ;;  %v1057_v49 = vrot.slane %v993_v45, 1 }
 0x183   : > { %2287 = vmatmul.msk.f32.gmra.mxu1 %vm215_vm1, %v2759_v43 }
 0x187   : > { %v956_v22 = vpop.f32.mrf.mxu2  ;;  %v3270_v20 = vpop.f32.mrf.mxu0 }
 0x188   : > { %v887_v39 = vpop.f32.mrf.mxu1 }
 0x189   : > { %v3272_v41 = vadd.f32 %v948_v2, %v887_v39  ;;  %2319 = vmatmul.msk.f32.gmra.mxu2 %vm1426_vm3, %v3089_v52  ;;  %v996_v61 = vpop.f32.mrf.mxu3 }
 0x18a   : > { %2344 = vmatmul.msk.f32.gmra.mxu0 %vm1426_vm3, %v3105_v9  ;;  %v1058_v56 = vrot.slane %v996_v61, 1 }
 0x18b   : > { %2288 = vmatmul.msk.f32.gmra.mxu1 %vm215_vm1, %v2779_v47 }
 0x18c   : > { %v1059_v18 = vsel %vm789_vm2, %v1057_v49, %v1058_v56 }
 0x18f   : > { %v959_v43 = vpop.f32.mrf.mxu2  ;;  %v3280_v36 = vpop.f32.mrf.mxu0 }
 0x190   : > { %v890_v13 = vpop.f32.mrf.mxu1 }
 0x191   : > { %2320 = vmatmul.msk.f32.gmra.mxu2 %vm1426_vm3, %v3105_v9  ;;  %v3306_v0 = vpop.f32.mrf.mxu3  ;;  %v965_v13 = vadd.f32 %v3101_v27, %v3144_v59  ;;  %v1195_v59 = vrot.slane %v3280_v36, 1 }
 0x192   : > { %2345 = vmatmul.msk.f32.gmra.mxu0 %vm1426_vm3, %v3120_v11 }
 0x193   : > { %2289 = vmatmul.msk.f32.gmra.mxu1 %vm215_vm1, %v2799_v51 }
 0x197   : > { %v962_v52 = vpop.f32.mrf.mxu2  ;;  %v3288_v47 = vpop.f32.mrf.mxu0 }
 0x198   : > { %v892_v10 = vpop.f32.mrf.mxu1 }
 0x199   : > { %v3290_v25 = vadd.f32 %v953_v34, %v892_v10  ;;  %2321 = vmatmul.msk.f32.gmra.mxu2 %vm1426_vm3, %v3120_v11  ;;  %v1513_v11 = vld [vmem:[%s3696_s1 + $0x2d] sm:$0xff] }
 0x19a   : > { %2346 = vmatmul.msk.f32.gmra.mxu0 %vm1426_vm3, %v3133_v23  ;;  %1564 = vmatpush.msra.mxu3 %v1513_v11 }
 0x19b   : > { %2290 = vmatmul.msk.f32.gmra.mxu1 %vm215_vm1, %v2816_v54 }
 0x19f   : > { %v3298_v51 = vpop.f32.mrf.mxu2  ;;  %v3300_v63 = vpop.f32.mrf.mxu0 }
 0x1a0   : > { %v895_v9 = vpop.f32.mrf.mxu1 }
 0x1a1   : > { %v3302_v3 = vadd.f32 %v956_v22, %v895_v9  ;;  %2322 = vmatmul.msk.f32.gmra.mxu2 %vm1426_vm3, %v3133_v23  ;;  %v1512_v23 = vld [vmem:[%s3696_s1 + $0x25] sm:$0xff] }
 0x1a2   : > { %2347 = vmatmul.msk.f32.gmra.mxu0 %vm1426_vm3, %v3148_v35  ;;  %1565 = vmatpush.msra.mxu3 %v1512_v23 }
 0x1a3   : > { %2291 = vmatmul.msk.f32.gmra.mxu1 %vm215_vm1, %v2833_v57  ;;  %v1002_v57 = vpop.f32.mrf.mxu3 }
 0x1a4   : > { %v1062_v23 = vrot.slane %v1002_v57, 1  ;;  %v966_v57 = vadd.f32 %v3117_v46, %v3160_v62 }
 0x1a7   : > { %v3312_v54 = vpop.f32.mrf.mxu2  ;;  %v3317_v26 = vpop.f32.mrf.mxu0 }
 0x1a8   : > { %v898_v32 = vpop.f32.mrf.mxu1 }
 0x1a9   : > { %v3319_v17 = vadd.f32 %v959_v43, %v898_v32  ;;  %2323 = vmatmul.msk.f32.gmra.mxu2 %vm1426_vm3, %v3148_v35 }
 0x1aa   : > { %2348 = vmatmul.msk.f32.gmra.mxu0 %vm1426_vm3, %v3162_v15 }
 0x1ab   : > { %2292 = vmatmul.msk.f32.gmra.mxu1 %vm215_vm1, %v3728_v1  ;;  %v3338_v35 = vpop.f32.mrf.mxu3 }
 0x1af   : > { %v1486_v2 = vpop.f32.mrf.mxu2  ;;  %v3330_v40 = vpop.f32.mrf.mxu0 }
 0x1b0   : > { %v901_v14 = vpop.f32.mrf.mxu1 }
 0x1b1   : > { %2324 = vmatmul.msk.f32.gmra.mxu2 %vm1426_vm3, %v3162_v15  ;;  %v1190_v15 = vrot.slane %v3250_v5, 1  ;;  %v1060_v5 = vrot.slane %v3306_v0, 1 }
 0x1b2   : > { %2349 = vmatmul.msk.f32.gmra.mxu0 %vm1426_vm3, %v3176_v7 }
 0x1b3   : > { %2293 = vmatmul.msk.f32.gmra.mxu1 %vm215_vm1, %v3730_v48  ;;  %v964_v48 = vadd.f32 %v3085_v31, %v3130_v8  ;;  %v1192_v19 = vsel %vm789_vm2, %v1190_v15, %v1191_v30  ;;  %v3359_v39 = vpop.f32.mrf.mxu3  ;;  %v1193_v31 = vrot.slane %v3270_v20, 1  ;;  %v1061_v10 = vsel %vm789_vm2, %v1058_v56, %v1060_v5 }
 0x1b4   : > { %v1063_v56 = vsel %vm789_vm2, %v1060_v5, %v1062_v23 }
 0x1b5   : > { %v1097_v58 = vadd.f32 %v1059_v18, %v964_v48  ;;  %v1194_v9 = vsel %vm789_vm2, %v1191_v30, %v1193_v31  ;;  %v1099_v48 = vadd.f32 %v1063_v56, %v966_v57 }
 0x1b7   : > { %v3340_v1 = vpop.f32.mrf.mxu2  ;;  %v3342_v12 = vpop.f32.mrf.mxu0  ;;  %v1230_v43 = vadd.f32 %v1192_v19, %v1097_v58 }
 0x1b8   : > { %v1259_v50 = vpop.f32.mrf.mxu1 }
 0x1b9   : > { %2325 = vmatmul.msk.f32.gmra.mxu2 %vm1426_vm3, %v3176_v7  ;;  %v1323_v6 = vrot.slane %v1259_v50, 1 }
 0x1ba   : > { %2350 = vmatmul.msk.f32.gmra.mxu0 %vm1426_vm3, %v3190_v21 }
 0x1bb   : > { %v3382_v27 = vpop.f32.mrf.mxu3 }
 0x1bf   : > { %v3354_v34 = vpop.f32.mrf.mxu2  ;;  %v3356_v22 = vpop.f32.mrf.mxu0 }
 0x1c0   : > { %v1262_v7 = vpop.f32.mrf.mxu1 }
 0x1c1   : > { %v1324_v45 = vrot.slane %v1262_v7, 1  ;;  %2326 = vmatmul.msk.f32.gmra.mxu2 %vm1426_vm3, %v3190_v21  ;;  %v1098_v21 = vadd.f32 %v1061_v10, %v965_v13  ;;  %v1064_v13 = vrot.slane %v3338_v35, 1  ;;  %v1198_v10 = vrot.slane %v3300_v63, 1 }
 0x1c2   : > { %2351 = vmatmul.msk.f32.gmra.mxu0 %vm1426_vm3, %v3224_v33  ;;  %v1200_v63 = vrot.slane %v3317_v26, 1 }
 0x1c3   : > { %v1325_v8 = vsel %vm789_vm2, %v1323_v6, %v1324_v45  ;;  %v1231_v14 = vadd.f32 %v1194_v9, %v1098_v21  ;;  %v1014_v5 = vpop.f32.mrf.mxu3  ;;  %v967_v9 = vadd.f32 %v3142_v38, %v3188_v60  ;;  %v968_v38 = vadd.f32 %v3158_v42, %v3209_v16 }
 0x1c4   : > { %v1363_v52 = vadd.f32 %v1325_v8, %v1230_v43  ;;  %v1201_v56 = vsel %vm789_vm2, %v1198_v10, %v1200_v63  ;;  %v1069_v26 = vrot.slane %v1014_v5, 1  ;;  %v1202_v42 = vrot.slane %v3330_v40, 1 }
 0x1c6   : > { %v3371_v61 = vadd.f32 %v3059_v29, %v1363_v52  ;;  %v1197_v52 = vrot.slane %v3288_v47, 1 }
 0x1c7   : > { %v1494_v0 = vpop.f32.mrf.mxu2  ;;  %v3375_v11 = vpop.f32.mrf.mxu0 }
 0x1c8   : > { %v1412_v20 = vmax.f32 %v3371_v61, 0.0  ;;  %v1265_v32 = vpop.f32.mrf.mxu1  ;;  %v1199_v35 = vsel %vm789_vm2, %v1197_v52, %v1198_v10  ;;  %v1203_v52 = vsel %vm789_vm2, %v1200_v63, %v1202_v42 }
 0x1c9   : > { %v1326_v2 = vrot.slane %v1265_v32, 1  ;;  %2327 = vmatmul.msk.f32.gmra.mxu2 %vm1426_vm3, %v3224_v33  ;;  %v1196_v33 = vsel %vm789_vm2, %v1193_v31, %v1195_v59 }
 0x1ca   : > { %2306 = vmatmul.msk.f32.vlgmr.msra.gmra.mxu3 %vm1426_vm3, %v1412_v20  ;;  %2352 = vmatmul.msk.f32.gmra.mxu0 %vm1426_vm3, %v3236_v28  ;;  %v1232_v7 = vadd.f32 %v1196_v33, %v1099_v48 }
 0x1cb   : > { %v1327_v50 = vsel %vm789_vm2, %v1324_v45, %v1326_v2  ;;  %v1017_v21 = vpop.f32.mrf.mxu3 }
 0x1cc   : > { %v1364_v49 = vadd.f32 %v1327_v50, %v1231_v14  ;;  %v1067_v14 = vrot.slane %v3382_v27, 1  ;;  %v1071_v63 = vrot.slane %v1017_v21, 1 }
 0x1ce   : > { %v3392_v15 = vadd.f32 %v3059_v29, %v1364_v49 }
 0x1cf   : > { %v3395_v30 = vpop.f32.mrf.mxu2  ;;  %v3397_v36 = vpop.f32.mrf.mxu0 }
 0x1d0   : > { %v1268_v18 = vpop.f32.mrf.mxu1  ;;  %v1413_v19 = vmax.f32 %v3392_v15, 0.0 }
 0x1d1   : > { %v1328_v58 = vrot.slane %v1268_v18, 1  ;;  %2328 = vmatmul.msk.f32.gmra.mxu2 %vm1426_vm3, %v3236_v28  ;;  %v1065_v28 = vrot.slane %v3359_v39, 1 }
 0x1d2   : > { %2307 = vmatmul.msk.f32.gmra.mxu3 %vm1426_vm3, %v1413_v19  ;;  %2353 = vmatmul.msk.f32.gmra.mxu0 %vm1426_vm3, %v3252_v4 }
 0x1d3   : > { %v1329_v46 = vsel %vm789_vm2, %v1326_v2, %v1328_v58  ;;  %v1066_v0 = vsel %vm789_vm2, %v1064_v13, %v1065_v28  ;;  %v1068_v57 = vsel %vm789_vm2, %v1065_v28, %v1067_v14  ;;  %v1020_v58 = vpop.f32.mrf.mxu3  ;;  %v1070_v13 = vsel %vm789_vm2, %v1067_v14, %v1069_v26 }
 0x1d4   : > { %v1365_v62 = vadd.f32 %v1329_v46, %v1232_v7  ;;  %v1100_v32 = vadd.f32 %v1066_v0, %v967_v9  ;;  %v1101_v33 = vadd.f32 %v1068_v57, %v968_v38  ;;  %v1204_v38 = vrot.slane %v3342_v12, 1 }
 0x1d5   : > { %v970_v57 = vadd.f32 %v3204_v55, %v3248_v44 }
 0x1d6   : > { %v3409_v6 = vadd.f32 %v3059_v29, %v1365_v62  ;;  %v1233_v47 = vadd.f32 %v1199_v35, %v1100_v32  ;;  %v1234_v46 = vadd.f32 %v1201_v56, %v1101_v33  ;;  %v969_v62 = vadd.f32 %v3174_v53, %v3222_v24 }
 0x1d7   : > { %v3411_v45 = vpop.f32.mrf.mxu2  ;;  %v3413_v43 = vpop.f32.mrf.mxu0 }
 0x1d8   : > { %v1271_v31 = vpop.f32.mrf.mxu1  ;;  %v1414_v8 = vmax.f32 %v3409_v6, 0.0  ;;  %v1102_v10 = vadd.f32 %v1070_v13, %v969_v62 }
 0x1d9   : > { %2329 = vmatmul.msk.f32.gmra.mxu2 %vm1426_vm3, %v3252_v4  ;;  %v1330_v4 = vrot.slane %v1271_v31, 1 }
 0x1da   : > { %2308 = vmatmul.msk.f32.gmra.mxu3 %vm1426_vm3, %v1414_v8 }
 0x1db   : > { %v1023_v53 = vpop.f32.mrf.mxu3 }
 0x1dc   : > { %v1074_v21 = vrot.slane %v1023_v53, 1 }
 0x1df   : > { %v1502_v39 = vpop.f32.mrf.mxu2  ;;  %v3429_v23 = vpop.f32.mrf.mxu0 }
 0x1e0   : > { %v1274_v2 = vpop.f32.mrf.mxu1  ;;  %v1235_v39 = vadd.f32 %v1203_v52, %v1102_v10 }
 0x1e1   : > { %v1331_v59 = vrot.slane %v1274_v2, 1 }
 0x1e3   : > { %v1332_v50 = vsel %vm789_vm2, %v1330_v4, %v1331_v59  ;;  %v1026_v33 = vpop.f32.mrf.mxu3 }
 0x1e4   : > { %v1366_v60 = vadd.f32 %v1332_v50, %v1233_v47  ;;  %v1072_v50 = vrot.slane %v1020_v58, 1 }
 0x1e6   : > { %v3438_v49 = vadd.f32 %v3059_v29, %v1366_v60  ;;  %v1205_v60 = vrot.slane %v3356_v22, 1  ;;  %v1073_v56 = vsel %vm789_vm2, %v1071_v63, %v1072_v50  ;;  %v1207_v22 = vrot.slane %v3375_v11, 1 }
 0x1e7   : > { %v3441_v27 = vpop.f32.mrf.mxu0  ;;  %v1075_v52 = vsel %vm789_vm2, %v1072_v50, %v1074_v21  ;;  %v1209_v50 = vrot.slane %v3397_v36, 1 }
 0x1e8   : > { %v1277_v48 = vpop.f32.mrf.mxu1  ;;  %v1415_v18 = vmax.f32 %v3438_v49, 0.0  ;;  %v1206_v26 = vsel %vm789_vm2, %v1204_v38, %v1205_v60  ;;  %v1104_v53 = vadd.f32 %v1075_v52, %v3262_v37 }
 0x1e9   : > { %v1333_v7 = vrot.slane %v1277_v48, 1 }
 0x1ea   : > { %2309 = vmatmul.msk.f32.gmra.mxu3 %vm1426_vm3, %v1415_v18 }
 0x1eb   : > { %v1334_v16 = vsel %vm789_vm2, %v1331_v59, %v1333_v7 }
 0x1ec   : > { %v1367_v31 = vadd.f32 %v1334_v16, %v1234_v46  ;;  %v3452_v28 = vpop.f32.mrf.mxu2 }
 0x1ee   : > { %v3455_v5 = vadd.f32 %v3059_v29, %v1367_v31 }
 0x1ef   : > { %v3458_v9 = vpop.f32.mrf.mxu0 }
 0x1f0   : > { %v1280_v0 = vpop.f32.mrf.mxu1  ;;  %v1416_v40 = vmax.f32 %v3455_v5, 0.0 }
 0x1f1   : > { %v1335_v35 = vrot.slane %v1280_v0, 1 }
 0x1f2   : > { %2310 = vmatmul.msk.f32.gmra.mxu3 %vm1426_vm3, %v1416_v40 }
 0x1f3   : > { %v1336_v24 = vsel %vm789_vm2, %v1333_v7, %v1335_v35  ;;  %v1103_v7 = vadd.f32 %v1073_v56, %v970_v57  ;;  %v1029_v35 = vpop.f32.mrf.mxu3 }
 0x1f4   : > { %v1368_v32 = vadd.f32 %v1336_v24, %v1235_v39  ;;  %v3465_v2 = vpop.f32.mrf.mxu2  ;;  %v1208_v39 = vsel %vm789_vm2, %v1205_v60, %v1207_v22 }
 0x1f5   : > { %v1236_v31 = vadd.f32 %v1206_v26, %v1103_v7  ;;  %v1237_v38 = vadd.f32 %v1208_v39, %v1104_v53  ;;  %v1078_v53 = vrot.slane %v1029_v35, 1 }
 0x1f6   : > { %v3468_v14 = vadd.f32 %v3059_v29, %v1368_v32 }
 0x1f7   : > { %v1832_v59 = vpop.f32.mrf.mxu0 }
 0x1f8   : > { %v1283_v4 = vpop.f32.mrf.mxu1  ;;  %v1417_v47 = vmax.f32 %v3468_v14, 0.0  ;;  %v1881_v16 = vrot.slane %v1832_v59, 2 }
 0x1f9   : > { %v1337_v42 = vrot.slane %v1283_v4, 1  ;;  %v1076_v4 = vrot.slane %v1026_v33, 1 }
 0x1fa   : > { %2311 = vmatmul.msk.f32.gmra.mxu3 %vm1426_vm3, %v1417_v47 }
 0x1fb   : > { %v1077_v56 = vsel %vm789_vm2, %v1074_v21, %v1076_v4  ;;  %v1212_v4 = vrot.slane %v3429_v23, 1 }
 0x1fc   : > { %v1510_v48 = vpop.f32.mrf.mxu2 }
 0x1ff   : > { %v1835_v46 = vpop.f32.mrf.mxu0 }
 0x200   : > { %v1286_v58 = vpop.f32.mrf.mxu1  ;;  %v1882_v12 = vrot.slane %v1835_v46, 2  ;;  %v1105_v46 = vadd.f32 %v1077_v56, %v3272_v41 }
 0x201   : > { %v1338_v62 = vrot.slane %v1286_v58, 1  ;;  %v1210_v58 = vsel %vm789_vm2, %v1207_v22, %v1209_v50 }
 0x202   : > { %v3483_v44 = vsel %vm1880_vm4, %v1881_v16, %v1882_v12 }
 0x203   : > { %v1339_v55 = vsel %vm789_vm2, %v1337_v42, %v1338_v62 }
 0x204   : > { %v1369_v13 = vadd.f32 %v1339_v55, %v1236_v31  ;;  %v1626_v10 = vpop.f32.mrf.mxu2  ;;  %v1238_v31 = vadd.f32 %v1210_v58, %v1105_v46 }
 0x205   : > { %v1674_v26 = vrot.slane %v1626_v10, 1 }
 0x206   : > { %v3487_v0 = vadd.f32 %v3059_v29, %v1369_v13 }
 0x207   : > { %v1838_v32 = vpop.f32.mrf.mxu0 }
 0x208   : > { %v1289_v24 = vpop.f32.mrf.mxu1  ;;  %v1418_v11 = vmax.f32 %v3487_v0, 0.0  ;;  %v1884_v63 = vrot.slane %v1838_v32, 2  ;;  %v1211_v32 = vrot.slane %v3413_v43, 1  ;;  %v1710_v43 = vld [vmem:[%s3696_s1 + $0x45] sm:$0xff] }
 0x209   : > { %v1340_v59 = vrot.slane %v1289_v24, 1 }
 0x20a   : > { %2312 = vmatmul.msk.f32.gmra.mxu3 %vm1426_vm3, %v1418_v11  ;;  %v3498_v60 = vsel %vm1880_vm4, %v1882_v12, %v1884_v63  ;;  %v1032_v12 = vpop.f32.mrf.mxu3  ;;  %v1213_v50 = vsel %vm789_vm2, %v1211_v32, %v1212_v4 }
 0x20b   : > { %v1341_v57 = vsel %vm789_vm2, %v1338_v62, %v1340_v59  ;;  %v1079_v24 = vrot.slane %v1032_v12, 1 }
 0x20c   : > { %v1370_v37 = vadd.f32 %v1341_v57, %v1237_v38  ;;  %v1629_v48 = vpop.f32.mrf.mxu2  ;;  %v1711_v38 = vld [vmem:[%s3696_s1 + $0x4d] sm:$0xff] }
 0x20d   : > { %v1675_v33 = vrot.slane %v1629_v48, 1  ;;  %v1080_v63 = vsel %vm789_vm2, %v1078_v53, %v1079_v24  ;;  %1726 = vmatpush.msrb.mxu3 %v1711_v38 }
 0x20e   : > { %v3502_v7 = vadd.f32 %v3059_v29, %v1370_v37  ;;  %v1106_v35 = vadd.f32 %v1080_v63, %v3290_v25 }
 0x20f   : > { %v3508_v16 = vsel %vm789_vm2, %v1674_v26, %v1675_v33  ;;  %1727 = vmatpush.msrb.mxu3 %v1710_v43  ;;  %v1214_v26 = vrot.slane %v3441_v27, 1  ;;  %v1216_v27 = vrot.slane %v3458_v9, 1  ;;  %v1841_v14 = vpop.f32.mrf.mxu0 }
 0x210   : > { %v1292_v42 = vpop.f32.mrf.mxu1  ;;  %v1419_v36 = vmax.f32 %v3502_v7, 0.0  ;;  %v1239_v23 = vadd.f32 %v1213_v50, %v1106_v35 }
 0x211   : > { %v1342_v62 = vrot.slane %v1292_v42, 1 }
 0x212   : > { %2313 = vmatmul.msk.f32.gmra.mxu3 %vm1426_vm3, %v1419_v36 }
 0x213   : > { %v1343_v21 = vsel %vm789_vm2, %v1340_v59, %v1342_v62  ;;  %v1035_v59 = vpop.f32.mrf.mxu3  ;;  %v1215_v62 = vsel %vm789_vm2, %v1212_v4, %v1214_v26  ;;  %v1217_v4 = vsel %vm789_vm2, %v1214_v26, %v1216_v27 }
 0x214   : > { %v1371_v55 = vadd.f32 %v1343_v21, %v1238_v31  ;;  %v1632_v13 = vpop.f32.mrf.mxu2  ;;  %v1081_v37 = vrot.slane %v1035_v59, 1 }
 0x215   : > { %v1677_v22 = vrot.slane %v1632_v13, 1 }
 0x216   : > { %v3515_v41 = vadd.f32 %v3059_v29, %v1371_v55  ;;  %v1082_v46 = vsel %vm789_vm2, %v1079_v24, %v1081_v37 }
 0x217   : > { %v1678_v39 = vsel %vm789_vm2, %v1675_v33, %v1677_v22  ;;  %v1107_v12 = vadd.f32 %v1082_v46, %v3302_v3 }
 0x218   : > { %v1295_v52 = vpop.f32.mrf.mxu1  ;;  %v1420_v10 = vmax.f32 %v3515_v41, 0.0  ;;  %v1934_v41 = vlaneseq }
 0x219   : > { %v1344_v56 = vrot.slane %v1295_v52, 1  ;;  %v1240_v22 = vadd.f32 %v1215_v62, %v1107_v12 }
 0x21a   : > { %2314 = vmatmul.msk.f32.gmra.mxu3 %vm1426_vm3, %v1420_v10  ;;  %v1935_v46 = vshrl.u32 %v1934_v41, 7 }
 0x21b   : > { %v1038_v42 = vpop.f32.mrf.mxu3 }
 0x21c   : > { %v1083_v55 = vrot.slane %v1038_v42, 1  ;;  %v3600_v12 = vadd.s32 8, %v1935_v46 }
 0x21e   : > { %v1084_v24 = vsel %vm789_vm2, %v1081_v37, %v1083_v55  ;;  %vm1938_vm5 = vcmp.lt.s32.totalorder %v3600_v12, 13  ;;  %v148_v12 = vld [vmem:[%s3696_s1 + $0x66] sm:$0x1] }
 0x21f   : > { %v1108_v3 = vadd.f32 %v1084_v24, %v3319_v17 }
 0x220   : > { %v1298_v57 = vpop.f32.mrf.mxu1 }
 0x221   : > { %v1345_v48 = vrot.slane %v1298_v57, 1  ;;  %v1241_v50 = vadd.f32 %v1217_v4, %v1108_v3 }
 0x223   : > { %v1346_v33 = vsel %vm789_vm2, %v1344_v56, %v1345_v48 }
 0x224   : > { %v1372_v58 = vadd.f32 %v1346_v33, %v1239_v23  ;;  %v3596_v33 = vld [vmem:[%s3696_s1 + $0x65] ss:$0 sm:$0xff] }
 0x226   : > { %v1409_v25 = vadd.f32 %v3059_v29, %v1372_v58 }
 0x228   : > { %v1301_v31 = vpop.f32.mrf.mxu1  ;;  %v1421_v21 = vmax.f32 %v1409_v25, 0.0 }
 0x229   : > { %v1347_v13 = vrot.slane %v1301_v31, 1 }
 0x22a   : > { %2315 = vmatmul.msk.f32.gmra.mxu3 %vm1426_vm3, %v1421_v21 }
 0x22b   : > { %v1348_v52 = vsel %vm789_vm2, %v1345_v48, %v1347_v13 }
 0x22c   : > { %v1373_v53 = vadd.f32 %v1348_v52, %v1240_v22 }
 0x22e   : > { %v1410_v32 = vadd.f32 %v3059_v29, %v1373_v53 }
 0x230   : > { %v1304_v59 = vpop.f32.mrf.mxu1  ;;  %v1422_v63 = vmax.f32 %v1410_v32, 0.0 }
 0x231   : > { %v1349_v38 = vrot.slane %v1304_v59, 1 }
 0x232   : > { %2316 = vmatmul.msk.f32.gmra.mxu3 %vm1426_vm3, %v1422_v63 }
 0x233   : > { %v1350_v35 = vsel %vm789_vm2, %v1347_v13, %v1349_v38 }
 0x234   : > { %v1374_v9 = vadd.f32 %v1350_v35, %v1241_v50 }
 0x236   : > { %v1411_v57 = vadd.f32 %v3059_v29, %v1374_v9 }
 0x238   : > { %v1423_v56 = vmax.f32 %v1411_v57, 0.0 }
 0x23a   : > { %2317 = vmatmul.msk.f32.gmra.mxu3 %vm1426_vm3, %v1423_v56 }
 0x242   : > { %2330 = vmatmul.msk.f32.vlgmr.msrb.gmra.mxu3 %vm1426_vm3, %v1412_v20 }
 0x24a   : > { %2331 = vmatmul.msk.f32.gmra.mxu3 %vm1426_vm3, %v1413_v19 }
 0x24d   : > { %v1567_v17 = vpop.f32.mrf.mxu3 }
 0x24e   : > { %v1599_v37 = vadd.f32 %v1567_v17, %v3298_v51 }
 0x250   : > { %v1702_v48 = vadd.f32 %v3508_v16, %v1599_v37 }
 0x252   : > { %2332 = vmatmul.msk.f32.gmra.mxu3 %vm1426_vm3, %v1414_v8 }
 0x255   : > { %v1570_v29 = vpop.f32.mrf.mxu3 }
 0x256   : > { %v1600_v43 = vadd.f32 %v1570_v29, %v3312_v54  ;;  %v1886_v29 = vrot.slane %v1841_v14, 2 }
 0x258   : > { %v1703_v23 = vadd.f32 %v1678_v39, %v1600_v43  ;;  %v1844_v39 = vpop.f32.mrf.mxu0 }
 0x25a   : > { %2333 = vmatmul.msk.f32.gmra.mxu3 %vm1426_vm3, %v1415_v18 }
 0x25d   : > { %v1573_v61 = vpop.f32.mrf.mxu3 }
 0x260   : > { %v1847_v22 = vpop.f32.mrf.mxu0 }
 0x261   : > { %v1889_v61 = vrot.slane %v1847_v22, 2 }
 0x262   : > { %2334 = vmatmul.msk.f32.gmra.mxu3 %vm1426_vm3, %v1416_v40  ;;  %v1635_v40 = vpop.f32.mrf.mxu2 }
 0x263   : > { %v1679_v3 = vrot.slane %v1635_v40, 1 }
 0x268   : > { %v1850_v17 = vpop.f32.mrf.mxu0 }
 0x26a   : > { %2335 = vmatmul.msk.f32.gmra.mxu3 %vm1426_vm3, %v1417_v47 }
 0x26d   : > { %v1575_v51 = vpop.f32.mrf.mxu3 }
 0x272   : > { %2336 = vmatmul.msk.f32.gmra.mxu3 %vm1426_vm3, %v1418_v11 }
 0x275   : > { %v1578_v54 = vpop.f32.mrf.mxu3 }
 0x276   : > { %v1602_v43 = vadd.f32 %v1578_v54, %v3354_v34 }
 0x27a   : > { %2337 = vmatmul.msk.f32.gmra.mxu3 %vm1426_vm3, %v1419_v36  ;;  %v1638_v36 = vpop.f32.mrf.mxu2 }
 0x27b   : > { %v1680_v32 = vrot.slane %v1638_v36, 1 }
 0x27d   : > { %v1581_v20 = vpop.f32.mrf.mxu3  ;;  %v1681_v35 = vsel %vm789_vm2, %v1679_v3, %v1680_v32 }
 0x282   : > { %2338 = vmatmul.msk.f32.gmra.mxu3 %vm1426_vm3, %v1420_v10  ;;  %v1641_v31 = vpop.f32.mrf.mxu2 }
 0x283   : > { %v1682_v37 = vrot.slane %v1641_v31, 1 }
 0x28a   : > { %2339 = vmatmul.msk.f32.gmra.mxu3 %vm1426_vm3, %v1421_v21  ;;  %v1644_v59 = vpop.f32.mrf.mxu2 }
 0x28d   : > { %v3581_v15 = vpop.f32.mrf.mxu3 }
 0x28e   : > { %v1603_v31 = vadd.f32 %v3581_v15, %v3395_v30 }
 0x292   : > { %2340 = vmatmul.msk.f32.gmra.mxu3 %vm1426_vm3, %v1422_v63 }
 0x295   : > { %v3584_v19 = vpop.f32.mrf.mxu3 }
 0x296   : > { %v1604_v15 = vadd.f32 %v3584_v19, %v3411_v45 }
 0x29a   : > { %2341 = vmatmul.msk.f32.gmra.mxu3 %vm1426_vm3, %v1423_v56  ;;  %v1887_v56 = vrot.slane %v1844_v39, 2 }
 0x29d   : > { %v1589_v6 = vpop.f32.mrf.mxu3 }
 0x2ad   : > { %v3587_v8 = vpop.f32.mrf.mxu3 }
 0x2b5   : > { %v3589_v49 = vpop.f32.mrf.mxu3 }
 0x2bd   : > { %v1597_v18 = vpop.f32.mrf.mxu3 }
 0x2be   : > { %v1647_v18 = vpop.f32.mrf.mxu2 }
 0x2c5   : > { %v1729_v5 = vpop.f32.mrf.mxu3 }
 0x2c6   : > { %v1777_v0 = vrot.slane %v1729_v5, 1  ;;  %v1650_v39 = vpop.f32.mrf.mxu2 }
 0x2cd   : > { %v1732_v47 = vpop.f32.mrf.mxu3 }
 0x2ce   : > { %v1778_v11 = vrot.slane %v1732_v47, 1  ;;  %v1653_v30 = vpop.f32.mrf.mxu2 }
 0x2d0   : > { %v1779_v7 = vsel %vm789_vm2, %v1777_v0, %v1778_v11 }
 0x2d1   : > { %v1805_v16 = vadd.f32 %v1779_v7, %v1702_v48  ;;  %v1853_v7 = vpop.f32.mrf.mxu0 }
 0x2d3   : > { %v1909_v10 = vadd.f32 %v3483_v44, %v1805_v16 }
 0x2d5   : > { %v1735_v26 = vpop.f32.mrf.mxu3  ;;  %v1918_v62 = vadd.f32 %v3596_v33, %v1909_v10 }
 0x2d6   : > { %v1780_v58 = vrot.slane %v1735_v26, 1 }
 0x2d7   : > { %v1926_v13 = vmax.f32 %v1918_v62, 0.0 }
 0x2d8   : > { %v1781_v42 = vsel %vm789_vm2, %v1778_v11, %v1780_v58  ;;  %v1890_v11 = vsel %vm1880_vm4, %v1887_v56, %v1889_v61 }
 0x2d9   : > { %v1806_v25 = vadd.f32 %v1781_v42, %v1703_v23  ;;  %v1948_v53 = vsel %vm1947_vm6, %v1926_v13, 0.0  ;;  %v1888_v23 = vsel %vm1880_vm4, %v1886_v29, %v1887_v56 }
 0x2db   : > { %v1910_v21 = vadd.f32 %v3498_v60, %v1806_v25  ;;  %v1601_v60 = vadd.f32 %v1575_v51, %v3340_v1  ;;  %v1683_v51 = vsel %vm789_vm2, %v1680_v32, %v1682_v37  ;;  %v1685_v25 = vrot.slane %v1647_v18, 1 }
 0x2dc   : > { %v1705_v5 = vadd.f32 %v1683_v51, %v1602_v43 }
 0x2dd   : > { %v1919_v44 = vadd.f32 %v3596_v33, %v1910_v21  ;;  %v1738_v55 = vpop.f32.mrf.mxu3  ;;  %v1704_v9 = vadd.f32 %v1681_v35, %v1601_v60  ;;  %v1684_v21 = vrot.slane %v1644_v59, 1  ;;  %v1892_v60 = vrot.slane %v1853_v7, 2 }
 0x2de   : > { %v1782_v38 = vrot.slane %v1738_v55, 1  ;;  %v1891_v35 = vrot.slane %v1850_v17, 2 }
 0x2df   : > { %v1927_v27 = vmax.f32 %v1919_v44, 0.0  ;;  %v1856_v44 = vpop.f32.mrf.mxu0 }
 0x2e1   : > { %v1940_v52 = vsel %vm1938_vm5, %v1927_v27, 0.0 }
 0x2e2   : > { %v1949_v24 = vsel %vm1947_vm6, %v1940_v52, 0.0 }
 0x2e3   : > { %v1950_v4 = vadd.f32 %v1949_v24, %v1948_v53  ;;  %v1686_v53 = vsel %vm789_vm2, %v1684_v21, %v1685_v25 }
 0x2e4   : > { %v1706_v32 = vadd.f32 %v1686_v53, %v1603_v31 }
 0x2e5   : > { %v1741_v63 = vpop.f32.mrf.mxu3  ;;  %v1951_v47 = vrot.slane %v1950_v4, 4 }
 0x2e6   : > { %v1783_v50 = vrot.slane %v1741_v63, 1 }
 0x2e7   : > { %v1952_v54 = vadd.f32 %v1951_v47, %v1950_v4  ;;  %v1656_v47 = vpop.f32.mrf.mxu2 }
 0x2e8   : > { %v1784_v57 = vsel %vm789_vm2, %v1782_v38, %v1783_v50  ;;  %v1687_v38 = vrot.slane %v1650_v39, 1  ;;  %v1605_v39 = vadd.f32 %v3587_v8, %v3452_v28  ;;  %v1606_v28 = vadd.f32 %v3589_v49, %v3465_v2 }
 0x2e9   : > { %v1807_v48 = vadd.f32 %v1784_v57, %v1704_v9  ;;  %v1953_v26 = vrot.slane %v1952_v54, 2  ;;  %v1893_v9 = vsel %vm1880_vm4, %v1891_v35, %v1892_v60  ;;  %v2472_v2 = vmov 0  }
 0x2ea   : > { %v1688_v29 = vsel %vm789_vm2, %v1685_v25, %v1687_v38  ;;  %2401 = vset.pattern.permute.xlu0 %v2472_v2 }
 0x2eb   : > { %v1911_v20 = vadd.f32 %v1888_v23, %v1807_v48  ;;  %v1954_v22 = vadd.f32 %v1953_v26, %v1952_v54  ;;  %v1894_v48 = vrot.slane %v1856_v44, 2  ;;  %v1707_v61 = vadd.f32 %v1688_v29, %v1604_v15  ;;  %v149_v15 = vld [vmem:[%s3696_s1 + $0x67] sm:$0x1] }
 0x2ec   : > { %v1689_v26 = vrot.slane %v1653_v30, 1  ;;  %1990 = vperm.xlu0 %2401, %v149_v15  }
 0x2ed   : > { %v1744_v1 = vpop.f32.mrf.mxu3  ;;  %v1920_v14 = vadd.f32 %v3596_v33, %v1911_v20  ;;  %v1955_v63 = vrot.slane %v1954_v22, 1  ;;  %v1895_v19 = vsel %vm1880_vm4, %v1892_v60, %v1894_v48 }
 0x2ee   : > { %v1785_v6 = vrot.slane %v1744_v1, 1  ;;  %v1859_v1 = vpop.f32.mrf.mxu0 }
 0x2ef   : > { %v1928_v41 = vmax.f32 %v1920_v14, 0.0  ;;  %v1956_v56 = vadd.f32 %v1955_v63, %v1954_v22  ;;  %v1896_v53 = vrot.slane %v1859_v1, 2 }
 0x2f0   : > { %v1786_v40 = vsel %vm789_vm2, %v1783_v50, %v1785_v6 }
 0x2f1   : > { %v1808_v0 = vadd.f32 %v1786_v40, %v1705_v5  ;;  %v1957_v46 = vsel %vm1947_vm6, %v1928_v41, 0.0  ;;  %v1984_v6 = vmul.f32 0.07692308, %v1956_v56  ;;  %v1690_v41 = vrot.slane %v1656_v47, 1 }
 0x2f3   : > { %v1912_v34 = vadd.f32 %v1890_v11, %v1808_v0  ;;  %v1691_v31 = vsel %vm789_vm2, %v1689_v26, %v1690_v41 }
 0x2f4   : > { %v1708_v44 = vadd.f32 %v1691_v31, %v1605_v39 }
 0x2f5   : > { %v1921_v36 = vadd.f32 %v3596_v33, %v1912_v34  ;;  %v1747_v16 = vpop.f32.mrf.mxu3 }
 0x2f6   : > { %v1787_v27 = vrot.slane %v1747_v16, 1  ;;  %v1862_v34 = vpop.f32.mrf.mxu0 }
 0x2f7   : > { %v1929_v10 = vmax.f32 %v1921_v36, 0.0 }
 0x2f9   : > { %v1942_v58 = vsel %vm1938_vm5, %v1929_v10, 0.0 }
 0x2fa   : > { %v1958_v42 = vsel %vm1947_vm6, %v1942_v58, 0.0 }
 0x2fb   : > { %v1959_v62 = vadd.f32 %v1958_v42, %v1957_v46 }
 0x2fd   : > { %v1960_v55 = vrot.slane %v1959_v62, 4  ;;  %v1750_v13 = vpop.f32.mrf.mxu3 }
 0x2fe   : > { %v1788_v52 = vrot.slane %v1750_v13, 1  ;;  %v1897_v13 = vrot.slane %v1862_v34, 2 }
 0x2ff   : > { %v1961_v24 = vadd.f32 %v1960_v55, %v1959_v62  ;;  %v1659_v62 = vpop.f32.mrf.mxu2 }
 0x300   : > { %v1789_v4 = vsel %vm789_vm2, %v1787_v27, %v1788_v52  ;;  %v1692_v27 = vrot.slane %v1659_v62, 1 }
 0x301   : > { %v1962_v3 = vrot.slane %v1961_v24, 2  ;;  %v1809_v50 = vadd.f32 %v1789_v4, %v1706_v32  ;;  %v1898_v32 = vsel %vm1880_vm4, %v1896_v53, %v1897_v13 }
 0x302   : > { %v1693_v63 = vsel %vm789_vm2, %v1690_v41, %v1692_v27 }
 0x303   : > { %v1963_v59 = vadd.f32 %v1962_v3, %v1961_v24  ;;  %v1913_v43 = vadd.f32 %v1893_v9, %v1809_v50  ;;  %v1865_v24 = vpop.f32.mrf.mxu0  ;;  %v1709_v35 = vadd.f32 %v1693_v63, %v1606_v28 }
 0x304   : > { %v1899_v3 = vrot.slane %v1865_v24, 2 }
 0x305   : > { %v1753_v57 = vpop.f32.mrf.mxu3  ;;  %v1964_v37 = vrot.slane %v1963_v59, 1  ;;  %v1922_v18 = vadd.f32 %v3596_v33, %v1913_v43 }
 0x306   : > { %v1790_v23 = vrot.slane %v1753_v57, 1  ;;  %v1900_v57 = vsel %vm1880_vm4, %v1897_v13, %v1899_v3 }
 0x307   : > { %v1965_v51 = vadd.f32 %v1964_v37, %v1963_v59  ;;  %v1930_v14 = vmax.f32 %v1922_v18, 0.0 }
 0x308   : > { %v1791_v17 = vsel %vm789_vm2, %v1788_v52, %v1790_v23 }
 0x309   : > { %v1810_v20 = vadd.f32 %v1791_v17, %v1707_v61  ;;  %v1985_v45 = vmul.f32 0.07692308, %v1965_v51  ;;  %v1966_v36 = vsel %vm1947_vm6, %v1930_v14, 0.0 }
 0x30b   : > { %v1914_v5 = vadd.f32 %v1895_v19, %v1810_v20  ;;  %v1998_v40 = vsel %vm1997_vm7, %v1985_v45, %v1984_v6 }
 0x30d   : > { %v1923_v0 = vadd.f32 %v3596_v33, %v1914_v5  ;;  %v1756_v11 = vpop.f32.mrf.mxu3 }
 0x30e   : > { %v1792_v42 = vrot.slane %v1756_v11, 1 }
 0x30f   : > { %v1931_v7 = vmax.f32 %v1923_v0, 0.0 }
 0x311   : > { %v1944_v54 = vsel %vm1938_vm5, %v1931_v7, 0.0 }
 0x312   : > { %v1967_v16 = vsel %vm1947_vm6, %v1944_v54, 0.0 }
 0x313   : > { %v1968_v10 = vadd.f32 %v1967_v16, %v1966_v36 }
 0x315   : > { %v1969_v58 = vrot.slane %v1968_v10, 4  ;;  %v1759_v46 = vpop.f32.mrf.mxu3 }
 0x316   : > { %v1793_v25 = vrot.slane %v1759_v46, 1 }
 0x317   : > { %v1970_v21 = vadd.f32 %v1969_v58, %v1968_v10 }
 0x318   : > { %v1794_v55 = vsel %vm789_vm2, %v1792_v42, %v1793_v25 }
 0x319   : > { %v1971_v22 = vrot.slane %v1970_v21, 2  ;;  %v1811_v52 = vadd.f32 %v1794_v55, %v1708_v44 }
 0x31b   : > { %v1972_v8 = vadd.f32 %v1971_v22, %v1970_v21  ;;  %v1915_v38 = vadd.f32 %v1898_v32, %v1811_v52 }
 0x31d   : > { %v1762_v4 = vpop.f32.mrf.mxu3  ;;  %v1973_v60 = vrot.slane %v1972_v8, 1  ;;  %v1924_v56 = vadd.f32 %v3596_v33, %v1915_v38 }
 0x31e   : > { %v1795_v50 = vrot.slane %v1762_v4, 1 }
 0x31f   : > { %v1974_v30 = vadd.f32 %v1973_v60, %v1972_v8  ;;  %v1932_v43 = vmax.f32 %v1924_v56, 0.0 }
 0x320   : > { %v1796_v59 = vsel %vm789_vm2, %v1793_v25, %v1795_v50 }
 0x321   : > { %v1812_v49 = vadd.f32 %v1796_v59, %v1709_v35  ;;  %v1986_v9 = vmul.f32 0.07692308, %v1974_v30  ;;  %v1975_v61 = vsel %vm1947_vm6, %v1932_v43, 0.0 }
 0x323   : > { %v1916_v37 = vadd.f32 %v1900_v57, %v1812_v49  ;;  %v2000_v48 = vsel %vm1999_vm8, %v1986_v9, %v1998_v40 }
 0x325   : > { %v1925_v29 = vadd.f32 %v3596_v33, %v1916_v37 }
 0x327   : > { %v1933_v23 = vmax.f32 %v1925_v29, 0.0 }
 0x329   : > { %v1946_v1 = vsel %vm1938_vm5, %v1933_v23, 0.0 }
 0x32a   : > { %v1976_v51 = vsel %vm1947_vm6, %v1946_v1, 0.0 }
 0x32b   : > { %v1977_v17 = vadd.f32 %v1976_v51, %v1975_v61 }
 0x32d   : > { %v1978_v20 = vrot.slane %v1977_v17, 4 }
 0x32f   : > { %v1979_v6 = vadd.f32 %v1978_v20, %v1977_v17 }
 0x331   : > { %v1980_v45 = vrot.slane %v1979_v6, 2 }
 0x333   : > { %v1981_v19 = vadd.f32 %v1980_v45, %v1979_v6 }
 0x335   : > { %v1982_v18 = vrot.slane %v1981_v19, 1 }
 0x337   : > { %v1983_v5 = vadd.f32 %v1982_v18, %v1981_v19 }
 0x339   : > { %v1987_v40 = vmul.f32 0.07692308, %v1983_v5 }
 0x33b   : > { %v2002_v33 = vsel %vm2001_vm9, %v1987_v40, %v2000_v48 }
 0x33c   : > { %2354 = vmatpush.xpose.msk.msra.mxu1 %vm1947_vm6, %v2002_v33 }
 0x33f   : > { %2355 = vmatmul.msk.f32.vlgmr.msra.gmra.mxu1 %vm1947_vm6, %v148_v12 }
 0x35e   : > { %v1991_v47 = vpop.permute.xlu0 %1990 }
 0x3bc   : > { %v2025_v0 = vpop.f32.mrf.mxu1 }
 0x3bd   : > { %v2026_v11 = vadd.f32 %v2025_v0, %v1991_v47 }
 0x3bf   : > { %v2356_v14 = vmul.f32 -1.442695, %v2026_v11 }
 0x3c1   : > { %2404 = vpow2.f32 %v2356_v14 }
 0x3c7   : > { %v2405_v7 = vpop.eup %2404 }
 0x3c8   : > { %v2031_v34 = vadd.f32 1.0, %v2405_v7 }
 0x3ca   : > { %2406 = vrcp.f32 %v2031_v34  ;;  %v2043_v41 = vand.u32 2147483648, %v2031_v34  ;;  %v2041_v39 = vand.u32 2147483647, %v2031_v34  ;;  %vm2037_vm11 = vweird.f32 %v2031_v34 }
 0x3cc   : > { %v2044_v58 = vor.u32 1.1754944e-38, %v2043_v41  ;;  %vm2042_vm14 = vcmp.eq.f32.partialorder %v2041_v39, 8.507059e+37 }
 0x3d0   : > { %v2407_v54 = vpop.eup %2406 }
 0x3d1   : > { %v2033_v36 = vmul.f32 %v2407_v54, %v2031_v34  ;;  %vm2038_vm10 = vweird.f32 %v2407_v54 }
 0x3d2   : > { %vm2039_vm12 = vmor %vm2037_vm11, %vm2038_vm10 }
 0x3d3   : > { %v2034_v16 = vsub.f32 1.0, %v2033_v36 }
 0x3d5   : > { %v2035_v10 = vmul.f32 %v2407_v54, %v2034_v16 }
 0x3d7   : > { %v2036_v26 = vadd.f32 %v2407_v54, %v2035_v10 }
 0x3d9   : > { %v2040_v46 = vsel %vm2039_vm12, %v2407_v54, %v2036_v26 }
 0x3da   : > { %v2045_v42 = vsel %vm2042_vm14, %v2044_v58, %v2040_v46 }
 0x3db   : > { %2048 = vst.msk [vmem:[%s138_s30] sm:$0x1] %vm2047_vm13, %v2045_v42 }
 0x3dc   : > { %2435 = shalt.err (!%p2432_p3)
}
 0x3dd   : > { %2361 = dma.vmem_to_hbm [thread:$0]  (%p2526_p5), %s2061_s3, 16, %s2063_s4, %s2050_s13  }
 0x3de PF: > { %p2367_p4 = scmp.ge.s32.totalorder %s2470_s12, 2  ;;  %s2074_s21 = sand.u32 1, %s2458_s9  }
 0x3df   : > { %s2075_s22 = scalar_lea.sflag [#allocation3], %s2074_s21 }
 0x3e0   : > { %p2364_p7 = pnand %p2367_p4, %p2530_p6 }
 0x3e2   : > { %p2365_p8 = pneg %p2364_p7 }
 0x3e4   : > { %2453 = dma.done.wait (%p2365_p8), %s2075_s22, 16  }
 0x3e5   : > { %2455 = vsyncadd (%p2365_p8), %s2075_s22, 4294967280  ;;  %p12_p9 = scmp.ge.s32.totalorder %s2513_s15, 4   ;;  %s3740_s9 = smov %s2462_s10 }
 0x3e6   : > { %s3741_s10 = smov %s2466_s11  ;;  %s3742_s11 = smov %s2524_s18 }
 0x3e7   : > { %s3743_s12 = smov %s2513_s15  ;;  %14 = sbr.rel (!%p12_p9) target bundleno = 3 (0x3), region = 63 }
 0x3ec   :  { %2080 = vsyncpa [#allocation3], 1 }
 0x3ed   :  { %2082 = vsyncpa [#allocation3 + $0x1], 1 }

</bundles_post_ra>
